<compile_context>
chip_gen: v7x
topology: tpu7x:2x2x1
jax: 0.10.0
libtpu: 0.0.40
codegen_flags: <defaults>
</compile_context>

<pallas_src>
import jax
import jax.numpy as jnp
from jax.experimental import pallas as pl
from jax.experimental.pallas import tpu as pltpu

F32 = jnp.float32
BF16 = jnp.bfloat16


# ---------------------------------------------------------------------------
# Bilinear-interpolation matrices (PyTorch F.interpolate, align_corners=False)
# ---------------------------------------------------------------------------
def _bilinear_axis_matrix(n_in, n_out):
    if n_in == n_out:
        return jnp.eye(n_out, dtype=F32)
    scale = n_in / n_out
    src = jnp.maximum((jnp.arange(n_out, dtype=F32) + 0.5) * scale - 0.5, 0.0)
    i0 = jnp.clip(jnp.floor(src).astype(jnp.int32), 0, n_in - 1)
    i1 = jnp.minimum(i0 + 1, n_in - 1)
    w1 = src - i0.astype(F32)
    w0 = 1.0 - w1
    rows = jnp.arange(n_out)
    m = jnp.zeros((n_out, n_in), F32)
    m = m.at[rows, i0].add(w0)
    m = m.at[rows, i1].add(w1)
    return m


def _bilinear_resize_matrix(h_in, w_in, h_out, w_out, dtype=BF16):
    """(h_in*w_in, h_out*w_out) matrix R s.t. out_flat = x_flat(C, Hin*Win) @ R."""
    ry = _bilinear_axis_matrix(h_in, h_out)           # (h_out, h_in)
    rx = _bilinear_axis_matrix(w_in, w_out)           # (w_out, w_in)
    return jnp.kron(ry, rx).T.astype(dtype)           # (h_in*w_in, h_out*w_out)


def _fold_bn(w, bn, eps=1e-5):
    """Fold eval-mode BatchNorm into a 1x1 conv weight (Co, Cin) + bias (Co,)."""
    gamma, beta, mean, var = bn
    scale = gamma / jnp.sqrt(var + eps)
    return w * scale[:, None], beta - mean * scale


def _choose_tile_and_vmem(hw, foot_fn, requested=None):
    """Largest lane-dense (multiple-of-128) tile dividing HW that fits a ~44MiB
    VMEM budget; vmem_limit_bytes derived from the footprint (<= 64MiB, v7x)."""
    if requested is not None:
        assert hw % requested == 0
        cands = [requested]
    else:
        cands = [c for c in range(1024, 127, -128) if hw % c == 0] or [hw]
    budget = 44 << 20
    tile = cands[-1]
    for c in cands:
        if foot_fn(c) <= budget:
            tile = c
            break
    vmem = int(min(64 << 20, max(32 << 20, int(foot_fn(tile) * 1.5) + (1 << 20))))
    return tile, vmem


# ---------------------------------------------------------------------------
# Kernels.  Layout inside: (channels, pixels) -> pixels on lanes (lane-dense).
# All MXU operands are bf16; accumulation + elementwise math in f32.
# ---------------------------------------------------------------------------
def _glfpn_kernel_flag(xl_ref, xg_ref, xh_ref, rg_ref, rh_ref,
                       wll_ref, wlh_ref, wg_ref, bl_ref, bg_ref,
                       o_ref, glow_ref, hlow_ref):
    # Low-resolution convs (conv-first), computed once per batch element.
    @pl.when(pl.program_id(1) == 0)
    def _():
        glow_ref[...] = jnp.dot(wg_ref[...], xg_ref[0].astype(BF16),
                                preferred_element_type=F32).astype(BF16)
        hlow_ref[...] = jnp.dot(wlh_ref[...], xh_ref[0].astype(BF16),
                                preferred_element_type=F32).astype(BF16)

    # global branch: upsample(conv(x_global)) + bias -> Sigmoid
    g = jnp.dot(glow_ref[...], rg_ref[...],
                preferred_element_type=F32) + bg_ref[...]
    g = jax.nn.sigmoid(g)
    # local branch: conv(x_local) + upsample(conv(x_high)) + bias -> SiLU
    l = (jnp.dot(wll_ref[...], xl_ref[0].astype(BF16), preferred_element_type=F32)
         + jnp.dot(hlow_ref[...], rh_ref[...], preferred_element_type=F32)
         + bl_ref[...])
    l = l * jax.nn.sigmoid(l)
    o_ref[0] = (g + l * g).astype(o_ref.dtype)


def _glfpn_kernel_resize(xl_ref, xg_ref, rg_ref, wl_ref, wg_ref, bl_ref, bg_ref,
                         o_ref, glow_ref):
    @pl.when(pl.program_id(1) == 0)
    def _():
        glow_ref[...] = jnp.dot(wg_ref[...], xg_ref[0].astype(BF16),
                                preferred_element_type=F32).astype(BF16)

    g = jax.nn.sigmoid(jnp.dot(glow_ref[...], rg_ref[...],
                               preferred_element_type=F32) + bg_ref[...])
    l = jnp.dot(wl_ref[...], xl_ref[0].astype(BF16),
                preferred_element_type=F32) + bl_ref[...]
    l = l * jax.nn.sigmoid(l)
    o_ref[0] = (g + l * g).astype(o_ref.dtype)


def _glfpn_kernel_same(xl_ref, xg_ref, wl_ref, wg_ref, bl_ref, bg_ref, o_ref):
    g = jax.nn.sigmoid(jnp.dot(wg_ref[...], xg_ref[0].astype(BF16),
                               preferred_element_type=F32) + bg_ref[...])
    l = jnp.dot(wl_ref[...], xl_ref[0].astype(BF16),
                preferred_element_type=F32) + bl_ref[...]
    l = l * jax.nn.sigmoid(l)
    o_ref[0] = (g + l * g).astype(o_ref.dtype)


# ---------------------------------------------------------------------------
# Wrapper: NCHW in / NCHW out, exactly like the PyTorch module.
# ---------------------------------------------------------------------------
def mult_glfpn_forward(xs, params, *, flag, tile_hw=None):
    if flag:
        x_local, x_global, x_high = xs
    else:
        x_local, x_global = xs
        x_high = None

    B, Cl, H, W = x_local.shape
    _, Cg, Hg, Wg = x_global.shape
    HW, Lg = H * W, Hg * Wg
    Co = params["w_local"].shape[0]
    out_dtype = x_local.dtype
    isz = jnp.dtype(out_dtype).itemsize

    wl_f, bl_f = _fold_bn(params["w_local"], params["bn_local"])
    wg_f, bg_f = _fold_bn(params["w_global"], params["bn_global"])
    bl_f = bl_f.reshape(Co, 1).astype(F32)
    bg_f = bg_f.reshape(Co, 1).astype(F32)
    wg_b = wg_f.astype(BF16)

    # Free (row-major) reshapes: NCHW -> (B, C, H*W); no transposes anywhere.
    xl2 = x_local.reshape(B, Cl, HW)
    xg2 = x_global.reshape(B, Cg, Lg)

    if flag:
        _, Ch, Hh, Wh = x_high.shape
        Lh = Hh * Wh
        xh2 = x_high.reshape(B, Ch, Lh)
        rg = _bilinear_resize_matrix(Hg, Wg, H, W)                # (Lg, HW) bf16
        rh = _bilinear_resize_matrix(Hh, Wh, H, W)                # (Lh, HW) bf16
        # channel concat [x_local ; x_high_up] realized by splitting the weight
        wll = wl_f[:, :Cl].astype(BF16)
        wlh = wl_f[:, Cl:].astype(BF16)

        def foot(t):
            return (2 * Cl * t * isz                      # xl tile (dbl-buffered)
                    + 2 * (Cg * Lg + Ch * Lh) * isz       # resident low-res inputs
                    + 2 * (Lg + Lh) * t * 2               # R tiles (bf16)
                    + 2 * Co * t * isz                    # output tile
                    + Co * (Lg + Lh) * 2                  # scratch
                    + 2 * Co * (Cl + Cg + Ch) * 2 + 16 * Co)

        tile, vmem = _choose_tile_and_vmem(HW, foot, tile_hw)
        cost = pl.CostEstimate(
            flops=2 * B * (Co * Cg * Lg + Co * Ch * Lh
                           + Co * (Lg + Lh) * HW + Co * Cl * HW),
            transcendentals=2 * B * Co * HW,
            bytes_accessed=int(B * isz * (Cl * HW + Cg * Lg + Ch * Lh + Co * HW)
                               + 2 * B * (Lg + Lh) * HW + 2 * Co * (Cl + Cg + Ch)))
        out = pl.pallas_call(
            _glfpn_kernel_flag,
            out_shape=jax.ShapeDtypeStruct((B, Co, HW), out_dtype),
            grid=(B, HW // tile),
            in_specs=[
                pl.BlockSpec((1, Cl, tile), lambda b, t: (b, 0, t)),
                pl.BlockSpec((1, Cg, Lg), lambda b, t: (b, 0, 0)),
                pl.BlockSpec((1, Ch, Lh), lambda b, t: (b, 0, 0)),
                pl.BlockSpec((Lg, tile), lambda b, t: (0, t)),
                pl.BlockSpec((Lh, tile), lambda b, t: (0, t)),
                pl.BlockSpec((Co, Cl), lambda b, t: (0, 0)),
                pl.BlockSpec((Co, Ch), lambda b, t: (0, 0)),
                pl.BlockSpec((Co, Cg), lambda b, t: (0, 0)),
                pl.BlockSpec((Co, 1), lambda b, t: (0, 0)),
                pl.BlockSpec((Co, 1), lambda b, t: (0, 0)),
            ],
            out_specs=pl.BlockSpec((1, Co, tile), lambda b, t: (b, 0, t)),
            scratch_shapes=[pltpu.VMEM((Co, Lg), BF16),
                            pltpu.VMEM((Co, Lh), BF16)],
            compiler_params=pltpu.CompilerParams(
                dimension_semantics=("parallel", "arbitrary"),
                vmem_limit_bytes=vmem),
            cost_estimate=cost,
        )(xl2, xg2, xh2, rg, rh, wll, wlh, wg_b, bl_f, bg_f)
        return out.reshape(B, Co, H, W)

    # ---------------- flag = False ----------------
    wl_b = wl_f.astype(BF16)
    if (Hg, Wg) == (H, W):
        # PyTorch skips the interpolate here: dedicated no-resize kernel.
        def foot(t):
            return (2 * (Cl + Cg) * t * isz + 2 * Co * t * isz
                    + 2 * Co * (Cl + Cg) * 2 + 16 * Co)

        tile, vmem = _choose_tile_and_vmem(HW, foot, tile_hw)
        cost = pl.CostEstimate(
            flops=2 * B * Co * (Cl + Cg) * HW,
            transcendentals=2 * B * Co * HW,
            bytes_accessed=int(B * isz * ((Cl + Cg + Co) * HW) + 2 * Co * (Cl + Cg)))
        out = pl.pallas_call(
            _glfpn_kernel_same,
            out_shape=jax.ShapeDtypeStruct((B, Co, HW), out_dtype),
            grid=(B, HW // tile),
            in_specs=[
                pl.BlockSpec((1, Cl, tile), lambda b, t: (b, 0, t)),
                pl.BlockSpec((1, Cg, tile), lambda b, t: (b, 0, t)),
                pl.BlockSpec((Co, Cl), lambda b, t: (0, 0)),
                pl.BlockSpec((Co, Cg), lambda b, t: (0, 0)),
                pl.BlockSpec((Co, 1), lambda b, t: (0, 0)),
                pl.BlockSpec((Co, 1), lambda b, t: (0, 0)),
            ],
            out_specs=pl.BlockSpec((1, Co, tile), lambda b, t: (b, 0, t)),
            compiler_params=pltpu.CompilerParams(
                dimension_semantics=("parallel", "parallel"),
                vmem_limit_bytes=vmem),
            cost_estimate=cost,
        )(xl2, xg2, wl_b, wg_b, bl_f, bg_f)
        return out.reshape(B, Co, H, W)

    rg = _bilinear_resize_matrix(Hg, Wg, H, W)                    # (Lg, HW) bf16

    def foot(t):
        return (2 * Cl * t * isz + 2 * Cg * Lg * isz + 2 * Lg * t * 2
                + 2 * Co * t * isz + Co * Lg * 2
                + 2 * Co * (Cl + Cg) * 2 + 16 * Co)

    tile, vmem = _choose_tile_and_vmem(HW, foot, tile_hw)
    cost = pl.CostEstimate(
        flops=2 * B * (Co * Cg * Lg + Co * Lg * HW + Co * Cl * HW),
        transcendentals=2 * B * Co * HW,
        bytes_accessed=int(B * isz * (Cl * HW + Cg * Lg + Co * HW)
                           + 2 * B * Lg * HW + 2 * Co * (Cl + Cg)))
    out = pl.pallas_call(
        _glfpn_kernel_resize,
        out_shape=jax.ShapeDtypeStruct((B, Co, HW), out_dtype),
        grid=(B, HW // tile),
        in_specs=[
            pl.BlockSpec((1, Cl, tile), lambda b, t: (b, 0, t)),
            pl.BlockSpec((1, Cg, Lg), lambda b, t: (b, 0, 0)),
            pl.BlockSpec((Lg, tile), lambda b, t: (0, t)),
            pl.BlockSpec((Co, Cl), lambda b, t: (0, 0)),
            pl.BlockSpec((Co, Cg), lambda b, t: (0, 0)),
            pl.BlockSpec((Co, 1), lambda b, t: (0, 0)),
            pl.BlockSpec((Co, 1), lambda b, t: (0, 0)),
        ],
        out_specs=pl.BlockSpec((1, Co, tile), lambda b, t: (b, 0, t)),
        scratch_shapes=[pltpu.VMEM((Co, Lg), BF16)],
        compiler_params=pltpu.CompilerParams(
            dimension_semantics=("parallel", "arbitrary"),
            vmem_limit_bytes=vmem),
        cost_estimate=cost,
    )(xl2, xg2, rg, wl_b, wg_b, bl_f, bg_f)
    return out.reshape(B, Co, H, W)


# ---------------------------------------------------------------------------
# Pure-JAX reference (mirrors the PyTorch module, eval-mode BN, gather resize)
# ---------------------------------------------------------------------------
def _ref_interpolate_bilinear(x, size):
    B, C, Hin, Win = x.shape
    H, W = size
    if (Hin, Win) == (H, W):
        return x

    def src_idx(n_in, n_out):
        scale = n_in / n_out
        s = jnp.maximum((jnp.arange(n_out, dtype=F32) + 0.5) * scale - 0.5, 0.0)
        i0 = jnp.clip(jnp.floor(s).astype(jnp.int32), 0, n_in - 1)
        i1 = jnp.minimum(i0 + 1, n_in - 1)
        t = s - i0.astype(F32)
        return i0, i1, t

    y0, y1, ty = src_idx(Hin, H)
    x0, x1, tx = src_idx(Win, W)
    top = (x[:, :, y0, :] * (1.0 - ty)[None, None, :, None]
           + x[:, :, y1, :] * ty[None, None, :, None])
    return (top[:, :, :, x0] * (1.0 - tx)[None, None, None, :]
            + top[:, :, :, x1] * tx[None, None, None, :])


def ref_mult_glfpn(xs, params, *, flag):
    hp = jax.lax.Precision.HIGHEST
    if flag:
        x_local, x_global, x_high = xs
    else:
        x_local, x_global = xs
    B, _, H, W = x_local.shape
    if flag:
        x_global = _ref_interpolate_bilinear(x_global, (H, W))
        x_high = _ref_interpolate_bilinear(x_high, (H, W))
        x_local = jnp.concatenate([x_local, x_high], axis=1)
    else:
        if x_global.shape[2] != H:
            x_global = _ref_interpolate_bilinear(x_global, (H, W))

    def conv_bn(x, w, bn, eps=1e-5):
        gamma, beta, mean, var = bn
        y = jnp.einsum("oc,bchw->bohw", w, x, precision=hp)
        scale = gamma / jnp.sqrt(var + eps)
        return y * scale[None, :, None, None] + (beta - mean * scale)[None, :, None, None]

    l = conv_bn(x_local, params["w_local"], params["bn_local"])
    l = l * jax.nn.sigmoid(l)                                     # SiLU
    g = conv_bn(x_global, params["w_global"], params["bn_global"])
    g = jax.nn.sigmoid(g)
    return g + l * g


if __name__ == "__main__":
    B, H, W = 2, 16, 16
    Cl, Cg, Ch, Co = 64, 128, 64, 128       # in_channel=[64,128,64], out_channel=128
    Hg = Wg = 8                             # x_global at half resolution
    Hh = Wh = 8                             # x_high at half resolution

    key = jax.random.PRNGKey(0)
    ks = jax.random.split(key, 12)
    x_local = jax.random.normal(ks[0], (B, Cl, H, W), jnp.float32)
    x_global = jax.random.normal(ks[1], (B, Cg, Hg, Wg), jnp.float32)
    x_high = jax.random.normal(ks[2], (B, Ch, Hh, Wh), jnp.float32)

    def make_bn(k, c):
        k1, k2, k3, k4 = jax.random.split(k, 4)
        return (1.0 + 0.1 * jax.random.normal(k1, (c,), jnp.float32),
                0.1 * jax.random.normal(k2, (c,), jnp.float32),
                0.1 * jax.random.normal(k3, (c,), jnp.float32),
                0.5 + jax.random.uniform(k4, (c,), jnp.float32))

    params_flag = {
        "w_local": 0.1 * jax.random.normal(ks[3], (Co, Cl + Ch), jnp.float32),
        "bn_local": make_bn(ks[4], Co),
        "w_global": 0.1 * jax.random.normal(ks[5], (Co, Cg), jnp.float32),
        "bn_global": make_bn(ks[6], Co),
    }
    params_noflag = {
        "w_local": 0.1 * jax.random.normal(ks[7], (Co, Cl), jnp.float32),
        "bn_local": make_bn(ks[8], Co),
        "w_global": 0.1 * jax.random.normal(ks[9], (Co, Cg), jnp.float32),
        "bn_global": make_bn(ks[10], Co),
    }

    tol = 5e-2  # bf16 single-pass MXU operands vs f32 HIGHEST reference

    # flag=True path (P3/P4): both x_global and x_high upsampled.
    out_t = jax.block_until_ready(
        mult_glfpn_forward((x_local, x_global, x_high), params_flag, flag=True))
    assert out_t.shape == (B, Co, H, W), out_t.shape
    ref_t = jax.block_until_ready(
        ref_mult_glfpn((x_local, x_global, x_high), params_flag, flag=True))
    err_t = float(jnp.max(jnp.abs(out_t - ref_t)))
    assert err_t < tol, f"flag=True max abs error too large: {err_t}"

    # flag=False path, x_global at lower resolution (resize kernel).
    out_f = jax.block_until_ready(
        mult_glfpn_forward((x_local, x_global), params_noflag, flag=False))
    ref_f = jax.block_until_ready(
        ref_mult_glfpn((x_local, x_global), params_noflag, flag=False))
    err_f = float(jnp.max(jnp.abs(out_f - ref_f)))
    assert err_f < tol, f"flag=False (resize) max abs error too large: {err_f}"

    # flag=False path, matching sizes (no-resize kernel, no identity matmul).
    x_global_full = jax.random.normal(ks[11], (B, Cg, H, W), jnp.float32)
    out_s = jax.block_until_ready(
        mult_glfpn_forward((x_local, x_global_full), params_noflag, flag=False))
    ref_s = jax.block_until_ready(
        ref_mult_glfpn((x_local, x_global_full), params_noflag, flag=False))
    err_s = float(jnp.max(jnp.abs(out_s - ref_s)))
    assert err_s < tol, f"flag=False (same size) max abs error too large: {err_s}"

    print("KERNEL_OK")
</pallas_src>

<mosaic_0001>
module attributes {stable_mosaic.version = 11 : i64} {
  func.func @_glfpn_kernel_flag(%arg0: i32, %arg1: i32, %arg2: memref<1x64x256xf32, #tpu.memory_space<vmem>>, %arg3: memref<1x128x64xf32, #tpu.memory_space<vmem>>, %arg4: memref<1x64x64xf32, #tpu.memory_space<vmem>>, %arg5: memref<64x256xbf16, #tpu.memory_space<vmem>>, %arg6: memref<64x256xbf16, #tpu.memory_space<vmem>>, %arg7: memref<128x64xbf16, #tpu.memory_space<vmem>>, %arg8: memref<128x64xbf16, #tpu.memory_space<vmem>>, %arg9: memref<128x128xbf16, #tpu.memory_space<vmem>>, %arg10: memref<128x1xf32, #tpu.memory_space<vmem>>, %arg11: memref<128x1xf32, #tpu.memory_space<vmem>>, %arg12: memref<1x128x256xf32, #tpu.memory_space<vmem>>, %arg13: memref<128x64xbf16, #tpu.memory_space<vmem>>, %arg14: memref<128x64xbf16, #tpu.memory_space<vmem>>) attributes {dimension_semantics = [#tpu.dimension_semantics<parallel>, #tpu.dimension_semantics<arbitrary>], iteration_bounds = array<i64: 2, 1>, scalar_prefetch = 0 : i64, scratch_operands = 2 : i64, tpu.core_type = #tpu.core_type<tc>, window_params = [{transform_indices = @transform_0, window_bounds = array<i64: 1, 64, 256>}, {transform_indices = @transform_1, window_bounds = array<i64: 1, 128, 64>}, {transform_indices = @transform_2, window_bounds = array<i64: 1, 64, 64>}, {transform_indices = @transform_3, window_bounds = array<i64: 64, 256>}, {transform_indices = @transform_4, window_bounds = array<i64: 64, 256>}, {pipeline_mode = #tpu.pipeline_mode<synchronous>, transform_indices = @transform_5, window_bounds = array<i64: 128, 64>}, {pipeline_mode = #tpu.pipeline_mode<synchronous>, transform_indices = @transform_6, window_bounds = array<i64: 128, 64>}, {pipeline_mode = #tpu.pipeline_mode<synchronous>, transform_indices = @transform_7, window_bounds = array<i64: 128, 128>}, {pipeline_mode = #tpu.pipeline_mode<synchronous>, transform_indices = @transform_8, window_bounds = array<i64: 128, 1>}, {pipeline_mode = #tpu.pipeline_mode<synchronous>, transform_indices = @transform_9, window_bounds = array<i64: 128, 1>}, {transform_indices = @transform_10, window_bounds = array<i64: 1, 128, 256>}]} {
    %c0_i32 = arith.constant 0 : i32
    %0 = arith.cmpi eq, %arg1, %c0_i32 : i32
    %1 = arith.extui %0 : i1 to i32
    %c0_i32_0 = arith.constant 0 : i32
    %2 = arith.cmpi ne, %1, %c0_i32_0 : i32
    scf.if %2 {
      %c0_24 = arith.constant 0 : index
      %c0_25 = arith.constant 0 : index
      %37 = vector.load %arg9[%c0_24, %c0_25] : memref<128x128xbf16, #tpu.memory_space<vmem>>, vector<128x128xbf16>
      %c0_26 = arith.constant 0 : index
      %c0_27 = arith.constant 0 : index
      %c0_28 = arith.constant 0 : index
      %38 = vector.load %arg3[%c0_26, %c0_27, %c0_28] : memref<1x128x64xf32, #tpu.memory_space<vmem>>, vector<1x128x64xf32>
      %39 = vector.shape_cast %38 : vector<1x128x64xf32> to vector<128x64xf32>
      %40 = arith.truncf %39 : vector<128x64xf32> to vector<128x64xbf16>
      %cst_29 = arith.constant dense<0.000000e+00> : vector<128x64xf32>
      %41 = tpu.matmul %37, %40, %cst_29 {dimension_numbers = #tpu.dot_dimension_numbers<[1], [0], [0], [1], [0, 0, 1, 1], [], []>} : vector<128x128xbf16>, vector<128x64xbf16>, vector<128x64xf32> -> vector<128x64xf32>
      %42 = arith.truncf %41 : vector<128x64xf32> to vector<128x64xbf16>
      %c0_30 = arith.constant 0 : index
      %c0_31 = arith.constant 0 : index
      %43 = vector.load %arg13[%c0_30, %c0_31] : memref<128x64xbf16, #tpu.memory_space<vmem>>, vector<128x64xbf16>
      tpu.vector_store %arg13[%c0_30, %c0_31], %42 {strides = array<i32>} : memref<128x64xbf16, #tpu.memory_space<vmem>>, vector<128x64xbf16>,
      %c0_32 = arith.constant 0 : index
      %c0_33 = arith.constant 0 : index
      %44 = vector.load %arg8[%c0_32, %c0_33] : memref<128x64xbf16, #tpu.memory_space<vmem>>, vector<128x64xbf16>
      %c0_34 = arith.constant 0 : index
      %c0_35 = arith.constant 0 : index
      %c0_36 = arith.constant 0 : index
      %45 = vector.load %arg4[%c0_34, %c0_35, %c0_36] : memref<1x64x64xf32, #tpu.memory_space<vmem>>, vector<1x64x64xf32>
      %46 = vector.shape_cast %45 : vector<1x64x64xf32> to vector<64x64xf32>
      %47 = arith.truncf %46 : vector<64x64xf32> to vector<64x64xbf16>
      %cst_37 = arith.constant dense<0.000000e+00> : vector<128x64xf32>
      %48 = tpu.matmul %44, %47, %cst_37 {dimension_numbers = #tpu.dot_dimension_numbers<[1], [0], [0], [1], [0, 0, 1, 1], [], []>} : vector<128x64xbf16>, vector<64x64xbf16>, vector<128x64xf32> -> vector<128x64xf32>
      %49 = arith.truncf %48 : vector<128x64xf32> to vector<128x64xbf16>
      %c0_38 = arith.constant 0 : index
      %c0_39 = arith.constant 0 : index
      %50 = vector.load %arg14[%c0_38, %c0_39] : memref<128x64xbf16, #tpu.memory_space<vmem>>, vector<128x64xbf16>
      tpu.vector_store %arg14[%c0_38, %c0_39], %49 {strides = array<i32>} : memref<128x64xbf16, #tpu.memory_space<vmem>>, vector<128x64xbf16>,
    } else {
    }
    %c0 = arith.constant 0 : index
    %c0_1 = arith.constant 0 : index
    %3 = vector.load %arg13[%c0, %c0_1] : memref<128x64xbf16, #tpu.memory_space<vmem>>, vector<128x64xbf16>
    %c0_2 = arith.constant 0 : index
    %c0_3 = arith.constant 0 : index
    %4 = vector.load %arg5[%c0_2, %c0_3] : memref<64x256xbf16, #tpu.memory_space<vmem>>, vector<64x256xbf16>
    %cst = arith.constant dense<0.000000e+00> : vector<128x256xf32>
    %5 = tpu.matmul %3, %4, %cst {dimension_numbers = #tpu.dot_dimension_numbers<[1], [0], [0], [1], [0, 0, 1, 1], [], []>} : vector<128x64xbf16>, vector<64x256xbf16>, vector<128x256xf32> -> vector<128x256xf32>
    %c0_4 = arith.constant 0 : index
    %c0_5 = arith.constant 0 : index
    %6 = vector.load %arg11[%c0_4, %c0_5] : memref<128x1xf32, #tpu.memory_space<vmem>>, vector<128x1xf32>
    %7 = vector.broadcast %6 : vector<128x1xf32> to vector<128x256xf32>
    %8 = arith.addf %5, %7 : vector<128x256xf32>
    %9 = arith.negf %8 : vector<128x256xf32>
    %10 = math.exp %9 : vector<128x256xf32>
    %cst_6 = arith.constant 1.000000e+00 : f32
    %11 = vector.broadcast %cst_6 : f32 to vector<128x256xf32>
    %12 = arith.addf %11, %10 : vector<128x256xf32>
    %13 = arith.divf %11, %12 : vector<128x256xf32>
    %c0_7 = arith.constant 0 : index
    %c0_8 = arith.constant 0 : index
    %14 = vector.load %arg7[%c0_7, %c0_8] : memref<128x64xbf16, #tpu.memory_space<vmem>>, vector<128x64xbf16>
    %c0_9 = arith.constant 0 : index
    %c0_10 = arith.constant 0 : index
    %c0_11 = arith.constant 0 : index
    %15 = vector.load %arg2[%c0_9, %c0_10, %c0_11] : memref<1x64x256xf32, #tpu.memory_space<vmem>>, vector<1x64x256xf32>
    %16 = vector.shape_cast %15 : vector<1x64x256xf32> to vector<64x256xf32>
    %17 = arith.truncf %16 : vector<64x256xf32> to vector<64x256xbf16>
    %cst_12 = arith.constant dense<0.000000e+00> : vector<128x256xf32>
    %18 = tpu.matmul %14, %17, %cst_12 {dimension_numbers = #tpu.dot_dimension_numbers<[1], [0], [0], [1], [0, 0, 1, 1], [], []>} : vector<128x64xbf16>, vector<64x256xbf16>, vector<128x256xf32> -> vector<128x256xf32>
    %c0_13 = arith.constant 0 : index
    %c0_14 = arith.constant 0 : index
    %19 = vector.load %arg14[%c0_13, %c0_14] : memref<128x64xbf16, #tpu.memory_space<vmem>>, vector<128x64xbf16>
    %c0_15 = arith.constant 0 : index
    %c0_16 = arith.constant 0 : index
    %20 = vector.load %arg6[%c0_15, %c0_16] : memref<64x256xbf16, #tpu.memory_space<vmem>>, vector<64x256xbf16>
    %cst_17 = arith.constant dense<0.000000e+00> : vector<128x256xf32>
    %21 = tpu.matmul %19, %20, %cst_17 {dimension_numbers = #tpu.dot_dimension_numbers<[1], [0], [0], [1], [0, 0, 1, 1], [], []>} : vector<128x64xbf16>, vector<64x256xbf16>, vector<128x256xf32> -> vector<128x256xf32>
    %22 = arith.addf %18, %21 : vector<128x256xf32>
    %c0_18 = arith.constant 0 : index
    %c0_19 = arith.constant 0 : index
    %23 = vector.load %arg10[%c0_18, %c0_19] : memref<128x1xf32, #tpu.memory_space<vmem>>, vector<128x1xf32>
    %24 = vector.broadcast %23 : vector<128x1xf32> to vector<128x256xf32>
    %25 = arith.addf %22, %24 : vector<128x256xf32>
    %26 = arith.negf %25 : vector<128x256xf32>
    %27 = math.exp %26 : vector<128x256xf32>
    %cst_20 = arith.constant 1.000000e+00 : f32
    %28 = vector.broadcast %cst_20 : f32 to vector<128x256xf32>
    %29 = arith.addf %28, %27 : vector<128x256xf32>
    %30 = arith.divf %28, %29 : vector<128x256xf32>
    %31 = arith.mulf %25, %30 : vector<128x256xf32>
    %32 = arith.mulf %31, %13 : vector<128x256xf32>
    %33 = arith.addf %13, %32 : vector<128x256xf32>
    %c0_21 = arith.constant 0 : index
    %c0_22 = arith.constant 0 : index
    %c0_23 = arith.constant 0 : index
    %34 = vector.load %arg12[%c0_21, %c0_22, %c0_23] : memref<1x128x256xf32, #tpu.memory_space<vmem>>, vector<1x128x256xf32>
    %35 = vector.shape_cast %34 : vector<1x128x256xf32> to vector<128x256xf32>
    %36 = vector.shape_cast %33 : vector<128x256xf32> to vector<1x128x256xf32>
    tpu.vector_store %arg12[%c0_21, %c0_22, %c0_23], %36 {strides = array<i32>} : memref<1x128x256xf32, #tpu.memory_space<vmem>>, vector<1x128x256xf32>,
    return
  }
  func.func @transform_0(%arg0: i32, %arg1: i32) -> (i32, i32, i32) {
    %c0_i32 = arith.constant 0 : i32
    %c0_i32_0 = arith.constant 0 : i32
    return %arg0, %c0_i32, %arg1 : i32, i32, i32
  }
  func.func @transform_1(%arg0: i32, %arg1: i32) -> (i32, i32, i32) {
    %c0_i32 = arith.constant 0 : i32
    %c0_i32_0 = arith.constant 0 : i32
    %c0_i32_1 = arith.constant 0 : i32
    return %arg0, %c0_i32, %c0_i32_0 : i32, i32, i32
  }
  func.func @transform_2(%arg0: i32, %arg1: i32) -> (i32, i32, i32) {
    %c0_i32 = arith.constant 0 : i32
    %c0_i32_0 = arith.constant 0 : i32
    %c0_i32_1 = arith.constant 0 : i32
    return %arg0, %c0_i32, %c0_i32_0 : i32, i32, i32
  }
  func.func @transform_3(%arg0: i32, %arg1: i32) -> (i32, i32) {
    %c0_i32 = arith.constant 0 : i32
    %c0_i32_0 = arith.constant 0 : i32
    return %c0_i32, %arg1 : i32, i32
  }
  func.func @transform_4(%arg0: i32, %arg1: i32) -> (i32, i32) {
    %c0_i32 = arith.constant 0 : i32
    %c0_i32_0 = arith.constant 0 : i32
    return %c0_i32, %arg1 : i32, i32
  }
  func.func @transform_5(%arg0: i32, %arg1: i32) -> (i32, i32) {
    %c0_i32 = arith.constant 0 : i32
    %c0_i32_0 = arith.constant 0 : i32
    %c0_i32_1 = arith.constant 0 : i32
    return %c0_i32, %c0_i32_0 : i32, i32
  }
  func.func @transform_6(%arg0: i32, %arg1: i32) -> (i32, i32) {
    %c0_i32 = arith.constant 0 : i32
    %c0_i32_0 = arith.constant 0 : i32
    %c0_i32_1 = arith.constant 0 : i32
    return %c0_i32, %c0_i32_0 : i32, i32
  }
  func.func @transform_7(%arg0: i32, %arg1: i32) -> (i32, i32) {
    %c0_i32 = arith.constant 0 : i32
    %c0_i32_0 = arith.constant 0 : i32
    %c0_i32_1 = arith.constant 0 : i32
    return %c0_i32, %c0_i32_0 : i32, i32
  }
  func.func @transform_8(%arg0: i32, %arg1: i32) -> (i32, i32) {
    %c0_i32 = arith.constant 0 : i32
    %c0_i32_0 = arith.constant 0 : i32
    %c0_i32_1 = arith.constant 0 : i32
    return %c0_i32, %c0_i32_0 : i32, i32
  }
  func.func @transform_9(%arg0: i32, %arg1: i32) -> (i32, i32) {
    %c0_i32 = arith.constant 0 : i32
    %c0_i32_0 = arith.constant 0 : i32
    %c0_i32_1 = arith.constant 0 : i32
    return %c0_i32, %c0_i32_0 : i32, i32
  }
  func.func @transform_10(%arg0: i32, %arg1: i32) -> (i32, i32, i32) {
    %c0_i32 = arith.constant 0 : i32
    %c0_i32_0 = arith.constant 0 : i32
    return %arg0, %c0_i32, %arg1 : i32, i32, i32
  }
}

</mosaic_0001>

<bundles_post_ra>
// kernel: tpu_custom_call.1
= control target key start
LH: loop header
LB: loop body
LE: loop exit
PB: predicated region body
PF: predicated region fallthrough
CT: control target
= control target key end

     0   :  { %s4174_s0 = inlined_call_operand.vmem [shape: f32[2,64,256], index: 0, kind: input, shape index: {}]   ;;  %s4175_s1 = inlined_call_operand.vmem [shape: f32[2,128,64], index: 1, kind: input, shape index: {}]   ;;  %s4176_s2 = inlined_call_operand.vmem [shape: f32[2,64,64], index: 2, kind: input, shape index: {}]   ;;  %s4177_s3 = inlined_call_operand.vmem [shape: bf16[64,256], index: 3, kind: input, shape index: {}]   ;;  %s4178_s4 = inlined_call_operand.vmem [shape: bf16[64,256], index: 4, kind: input, shape index: {}]   ;;  %s4179_s5 = inlined_call_operand.vmem [shape: bf16[128,64], index: 5, kind: input, shape index: {}]   ;;  %s4180_s6 = inlined_call_operand.vmem [shape: bf16[128,64], index: 6, kind: input, shape index: {}]   ;;  %s4181_s7 = inlined_call_operand.vmem [shape: bf16[128,128], index: 7, kind: input, shape index: {}]   ;;  %s4182_s8 = inlined_call_operand.vmem [shape: f32[128,1], index: 8, kind: input, shape index: {}]   ;;  %s4183_s9 = inlined_call_operand.vmem [shape: f32[128,1], index: 9, kind: input, shape index: {}]   ;;  %s4184_s10 = inlined_call_operand.hbm [shape: f32[2,128,256], index: 10, kind: output, shape index: {}]  }
   0x1   :  { %4192 = sst [smem:[#allocation13_spill]] %s4175_s1 }
   0x2   :  { %15 = vsyncpa [#allocation5], 0 }
   0x3   :  { %17 = vsyncpa [#allocation5 + $0x1], 0  ;;  %s3160_s13 = smov 0   ;;  %s3162_s14 = smov 0  }
   0x4   :  { %s3164_s15 = smov 0   ;;  %s3166_s16 = smov 0  }
   0x5   :  { %s3168_s17 = smov 0   ;;  %s3170_s18 = smov 0  }
   0x6 LB: > { %s2374_s19 = sadd.s32 4294967295, %s3099_s18   ;;  %s2375_s20 = sadd.s32 4294967294, %s3099_s18   ;;  %s3099_s18 = sphi %s3170_s18, %s23_s18   ;;  %s3095_s17 = sphi %s3168_s17, %s4213_s17   ;;  %s3091_s16 = sphi %s3166_s16, %s4212_s16   ;;  %s3087_s15 = sphi %s3164_s15, %s4211_s15   ;;  %s3083_s14 = sphi %s3162_s14, %s4210_s14   ;;  %s3079_s13 = sphi %s3160_s13, %s4209_s13  }
   0x7   : > { %s35_s21 = sadd.s32 1, %s3095_s17  ;;  %s281_s22 = sadd.s32 1, %s3087_s15 }
   0x8   : > { %p37_p0 = scmp.ge.s32.totalorder %s35_s21, 2  ;;  %p291_p1 = scmp.ne.s32.totalorder %s3087_s15, %s3083_s14 }
   0x9   : > { %p292_p2 = scmp.eq.s32.totalorder %s2374_s19, 1  ;;  %p297_p3 = scmp.ne.s32.totalorder %s3083_s14, %s3079_s13 }
   0xa   : > { %s4215_s21 = smov (%p37_p0, %s35_s21), 0  ;;  %p298_p5 = scmp.eq.s32.totalorder %s2375_s20, 1 }
   0xb   : > { %p3200_p4 = por %p292_p2, %p291_p1  ;;  %s276_s24 = ssub.s32 %s3095_s17, %s4215_s21 }
   0xc   : > { %p2380_p6 = scmp.ge.s32.totalorder %s3099_s18, 1  ;;  %p279_p7 = scmp.eq.s32.totalorder %s276_s24, 0 }
   0xd   : > { %p3207_p8 = por %p298_p5, %p297_p3  ;;  %p378_p9 = scmp.lt.s32.totalorder %s3099_s18, 3 }
   0xe   : > { %s3213_s26 = scalar_select %p279_p7, %s3087_s15, %s281_s22  }
   0xf   : > { %p379_p10 = pnand %p2380_p6, %p378_p9 }
  0x11   : > { %382 = sbr.rel (%p379_p10) target bundleno = 677 (0x2a5), region = 60 }
  0x18   : > { %p441_p11 = scmp.lt.s32.totalorder %s3091_s16, 1  ;;  %vm671_vm0 = vcmask 523264   ;;  %v2717_v0 = vld [vmem:[%s4180_s6] sm:$0xff]   ;;  %s4195_s1 = sld [smem:[#allocation13_spill]]  ;;  %v2718_v31 = vld [vmem:[%s4180_s6 + $0x8] sm:$0xff]   ;;  %v2720_v32 = vld [vmem:[%s4180_s6 + $0x10] sm:$0xff]  }
  0x19   : > { %2601 = vmatprep.mubr.msk.bf16.mxu1 %vm671_vm0, %v2717_v0  ;;  %v2719_v1 = vld [vmem:[%s4181_s7] sm:$0xff]   ;;  %v2722_v41 = vld [vmem:[%s4180_s6 + $0x18] sm:$0xff]   ;;  %v2721_v45 = vld [vmem:[%s4181_s7 + $0x8] sm:$0xff]   ;;  %s3102_s20 = smov [#allocation4]  }
  0x1a   : > { %s3220_s29 = scalar_select %p441_p11, %s3091_s16, 1  ;;  %2577 = vmatprep.mubr.bf16.mxu0 %v2719_v1  ;;  %v2733_v36 = vld [vmem:[%s4177_s3] ss:$8 sps:$4 sm:$0xff]   ;;  %v2735_v37 = vld [vmem:[%s4177_s3 + $0x4] ss:$8 sps:$4 sm:$0xff]   ;;  %v2723_v46 = vld [vmem:[%s4181_s7 + $0x10] sm:$0xff]  }
  0x1b   : > { %v2729_v42 = vld [vmem:[%s4180_s6 + $0x20] sm:$0xff]   ;;  %v2730_v47 = vld [vmem:[%s4180_s6 + $0x28] sm:$0xff]   ;;  %v2731_v48 = vld [vmem:[%s4180_s6 + $0x30] sm:$0xff]   ;;  %s3025_s22 = sshll.u32 %s3102_s20, 4  ;;  %s3026_s22 = int_to_ptr.vmem [resolvable:$false] %s3025_s22 }
  0x1c   : > { %s4185_s12 = sshll.u32 %s3220_s29, 7  ;;  %s2531_s19 = sshll.u32 %s3220_s29, 6  ;;  %v2738_v44 = vld [vmem:[%s4178_s4 + $0x4] ss:$8 sps:$4 sm:$0xff]   ;;  %v3294_v49 = vld [vmem:[%s4178_s4] ss:$8 sps:$4 sm:$0xff]  }
  0x1d   : > { %s459_s30 = scalar_lea.vmem %s4176_s2, %s2531_s19  ;;  %v2724_v50 = vld [vmem:[%s4181_s7 + $0x18] sm:$0xff]   ;;  %v2725_v51 = vld [vmem:[%s4181_s7 + $0x20] sm:$0xff]   ;;  %v2726_v53 = vld [vmem:[%s4181_s7 + $0x28] sm:$0xff]  }
  0x1e   : > { %s3233_s24 = scalar_lea.vmem %s4195_s1, %s4185_s12  ;;  %v696_v6 = vld [vmem:[%s459_s30] sm:$0xff]  ;;  %v697_v7 = vld [vmem:[%s459_s30 + $0x8] sm:$0xff]  ;;  %v698_v11 = vld [vmem:[%s459_s30 + $0x10] sm:$0xff]  ;;  %s437_s12 = sand.u32 1, %s3083_s14  }
  0x1f   : > { %v494_v2 = vld [vmem:[%s3233_s24] sm:$0xff]  ;;  %v495_v3 = vld [vmem:[%s3233_s24 + $0x8] sm:$0xff]  ;;  %v496_v4 = vld [vmem:[%s3233_s24 + $0x10] sm:$0xff]  ;;  %v704_v9 = vpack.c.bf16 %v697_v7, %v696_v6  ;;  %s3697_s27 = sshll.u32 %s437_s12, 8 }
  0x20   : > { %v510_v5 = vpack.c.bf16 %v495_v3, %v494_v2  ;;  %v497_v8 = vld [vmem:[%s3233_s24 + $0x18] sm:$0xff]  ;;  %v498_v13 = vld [vmem:[%s3233_s24 + $0x20] sm:$0xff]  ;;  %v499_v15 = vld [vmem:[%s3233_s24 + $0x28] sm:$0xff]  ;;  %v3101_v2 = vmov 0  }
  0x21   : > { %v511_v10 = vpack.c.bf16 %v497_v8, %v496_v4  ;;  %v699_v12 = vld [vmem:[%s459_s30 + $0x18] sm:$0xff]  ;;  %v700_v16 = vld [vmem:[%s459_s30 + $0x20] sm:$0xff]  ;;  %v701_v17 = vld [vmem:[%s459_s30 + $0x28] sm:$0xff]  ;;  %2593 = vmatprep.subr.bf16.mxu1 %v704_v9  ;;  %v512_v18 = vpack.c.bf16 %v499_v15, %v498_v13  ;;  %2716 = vset.pattern.permute.xlu1 %v3101_v2 }
  0x22   : > { %2561 = vmatprep.subr.bf16.mxu0 %v510_v5  ;;  %v705_v14 = vpack.c.bf16 %v699_v12, %v698_v11  ;;  %2594 = vmatpush3.bf16.msra.mxu1 %v704_v9  ;;  %v706_v19 = vpack.c.bf16 %v701_v17, %v700_v16  ;;  %v500_v20 = vld [vmem:[%s3233_s24 + $0x30] sm:$0xff]  ;;  %v501_v21 = vld [vmem:[%s3233_s24 + $0x38] sm:$0xff]  ;;  %v502_v25 = vld [vmem:[%s3233_s24 + $0x40] sm:$0xff] }
  0x23   : > { %2562 = vmatpush3.bf16.msra.mxu0 %v510_v5  ;;  %v702_v22 = vld [vmem:[%s459_s30 + $0x30] sm:$0xff]  ;;  %v703_v23 = vld [vmem:[%s459_s30 + $0x38] sm:$0xff]  ;;  %v513_v24 = vpack.c.bf16 %v501_v21, %v500_v20  ;;  %v503_v27 = vld [vmem:[%s3233_s24 + $0x48] sm:$0xff]  ;;  %2715 = vset.pattern.permute.xlu0 %v3101_v2  ;;  %s4196_s30 = sshll.u32 %s3220_s29, 7  ;;  %s2532_s29 = sshll.u32 %s3091_s16, 12 }
  0x24   : > { %2563 = vmatprep.subr.bf16.mxu0 %v511_v10  ;;  %2595 = vmatprep.subr.bf16.mxu1 %v705_v14  ;;  %v707_v26 = vpack.c.bf16 %v703_v23, %v702_v22  ;;  %v514_v28 = vpack.c.bf16 %v503_v27, %v502_v25  ;;  %v504_v29 = vld [vmem:[%s3233_s24 + $0x50] sm:$0xff]  ;;  %v505_v30 = vld [vmem:[%s3233_s24 + $0x58] sm:$0xff]  ;;  %v506_v34 = vld [vmem:[%s3233_s24 + $0x60] sm:$0xff]  ;;  %s3375_s19 = scalar_lea.vmem %s4174_s0, %s4196_s30  ;;  %s4119_s11 = scalar_lea.hbm %s4184_s10, %s2532_s29 }
  0x25   : > { %v515_v33 = vpack.c.bf16 %v505_v30, %v504_v29  ;;  %v507_v35 = vld [vmem:[%s3233_s24 + $0x68] sm:$0xff]  ;;  %v508_v38 = vld [vmem:[%s3233_s24 + $0x70] sm:$0xff]  ;;  %v509_v39 = vld [vmem:[%s3233_s24 + $0x78] sm:$0xff]  ;;  %s4128_s16 = scalar_lea.sflag [#allocation5], %s437_s12 }
  0x26   : > { %2596 = vmatpush3.bf16.msra.mxu1 %v705_v14  ;;  %v516_v40 = vpack.c.bf16 %v507_v35, %v506_v34  ;;  %v517_v43 = vpack.c.bf16 %v509_v39, %v508_v38  ;;  %v2732_v52 = vld [vmem:[%s4180_s6 + $0x38] sm:$0xff]   ;;  %v2727_v54 = vld [vmem:[%s4181_s7 + $0x30] sm:$0xff]   ;;  %v3333_v58 = vld [vmem:[%s4178_s4 + $0x24] ss:$8 sps:$4 sm:$0xff]  }
  0x27   : > { %2564 = vmatpush3.bf16.msra.mxu0 %v511_v10  ;;  %2597 = vmatprep.subr.bf16.mxu1 %v706_v19  ;;  %v2728_v55 = vld [vmem:[%s4181_s7 + $0x38] sm:$0xff]   ;;  %v3338_v59 = vld [vmem:[%s4178_s4 + $0x20] ss:$8 sps:$4 sm:$0xff]   ;;  %v2753_v0 = vld [vmem:[%s4177_s3 + $0x24] ss:$8 sps:$4 sm:$0xff]  }
  0x28   : > { %2565 = vmatprep.subr.bf16.mxu0 %v512_v18  ;;  %v3321_v56 = vld [vmem:[%s4178_s4 + $0x14] ss:$8 sps:$4 sm:$0xff]   ;;  %v3326_v57 = vld [vmem:[%s4178_s4 + $0x10] ss:$8 sps:$4 sm:$0xff]   ;;  %v2751_v1 = vld [vmem:[%s4177_s3 + $0x20] ss:$8 sps:$4 sm:$0xff]  }
  0x29   : > { %v2742_v60 = vld [vmem:[%s4177_s3 + $0x10] ss:$8 sps:$4 sm:$0xff]   ;;  %v2744_v61 = vld [vmem:[%s4177_s3 + $0x14] ss:$8 sps:$4 sm:$0xff]   ;;  %v1384_v3 = vld [vmem:[%s3375_s19 + $0x8] sm:$0xff] }
  0x2a   : > { %2598 = vmatpush3.bf16.msra.mxu1 %v706_v19  ;;  %v3351_v62 = vld [vmem:[%s4178_s4 + $0x30] ss:$8 sps:$4 sm:$0xff]   ;;  %v3356_v63 = vld [vmem:[%s4178_s4 + $0x34] ss:$8 sps:$4 sm:$0xff]   ;;  %v901_v9 = vld [vmem:[%s4183_s9] sm:$0xff] }
  0x2b   : > { %2566 = vmatpush3.bf16.msra.mxu0 %v512_v18  ;;  %2599 = vmatprep.subr.bf16.mxu1 %v707_v26  ;;  %v1386_v4 = vld [vmem:[%s3375_s19 + $0x18] sm:$0xff]  ;;  %v903_v8 = vld [vmem:[%s4183_s9 + $0x10] sm:$0xff]  ;;  %v902_v11 = vld [vmem:[%s4183_s9 + $0x8] sm:$0xff] }
  0x2c   : > { %2567 = vmatprep.subr.bf16.mxu0 %v513_v24  ;;  %v1400_v5 = vpack.c.bf16 %v1386_v4, %v1384_v3  ;;  %v2754_v6 = vld [vmem:[%s4177_s3 + $0x30] ss:$8 sps:$4 sm:$0xff]   ;;  %v2756_v7 = vld [vmem:[%s4177_s3 + $0x34] ss:$8 sps:$4 sm:$0xff]   ;;  %929 = vperm.xlu1 %2716, %v903_v8   ;;  %v906_v12 = vld [vmem:[%s4183_s9 + $0x28] sm:$0xff] }
  0x2d   : > { %919 = vperm.xlu0 %2715, %v901_v9   ;;  %v904_v10 = vld [vmem:[%s4183_s9 + $0x18] sm:$0xff]  ;;  %v905_v13 = vld [vmem:[%s4183_s9 + $0x20] sm:$0xff]  ;;  %v907_v15 = vld [vmem:[%s4183_s9 + $0x30] sm:$0xff] }
  0x2e   : > { %2600 = vmatpush3.bf16.msra.mxu1 %v707_v26  ;;  %v1777_v14 = vld [vmem:[%s4182_s8] sm:$0xff]  ;;  %v1779_v16 = vld [vmem:[%s4182_s8 + $0x10] sm:$0xff]  ;;  %v1778_v17 = vld [vmem:[%s4182_s8 + $0x8] sm:$0xff] }
  0x2f   : > { %2568 = vmatpush3.bf16.msra.mxu0 %v513_v24  ;;  %1062 = vmatprep.subr.bf16.mxu1 %v2735_v37  ;;  %v1781_v18 = vld [vmem:[%s4182_s8 + $0x20] sm:$0xff]  ;;  %v1780_v19 = vld [vmem:[%s4182_s8 + $0x18] sm:$0xff]  ;;  %v1783_v20 = vld [vmem:[%s4182_s8 + $0x30] sm:$0xff] }
  0x30   : > { %2569 = vmatprep.subr.bf16.mxu0 %v514_v28  ;;  %934 = vperm.xlu1 %2716, %v904_v10   ;;  %v1782_v21 = vld [vmem:[%s4182_s8 + $0x28] sm:$0xff]  ;;  %v1785_v22 = vld [vmem:[%s4182_s8 + $0x40] sm:$0xff]  ;;  %v1784_v23 = vld [vmem:[%s4182_s8 + $0x38] sm:$0xff] }
  0x31   : > { %2602 = vmatmul.mubr.msk.bf16.vlgmr.msra.gmra.mrb[0].mxu1 %vm671_vm0, %v2718_v31  ;;  %924 = vperm.xlu0 %2715, %v902_v11   ;;  %v1787_v24 = vld [vmem:[%s4182_s8 + $0x50] sm:$0xff]  ;;  %v1786_v25 = vld [vmem:[%s4182_s8 + $0x48] sm:$0xff]  ;;  %v1789_v26 = vld [vmem:[%s4182_s8 + $0x60] sm:$0xff] }
  0x32   : > { %2605 = vmatprep.mubr.msk.bf16.mxu1 %vm671_vm0, %v2720_v32  ;;  %1063 = vmatpush1.bf16.msra.mxu1 %v2733_v36  ;;  %v1788_v27 = vld [vmem:[%s4182_s8 + $0x58] sm:$0xff]  ;;  %v1790_v34 = vld [vmem:[%s4182_s8 + $0x68] sm:$0xff]  ;;  %v1383_v39 = vld [vmem:[%s3375_s19] sm:$0xff] }
  0x33   : > { %2570 = vmatpush3.bf16.msra.mxu0 %v514_v28  ;;  %1064 = vmatprep.subr.bf16.mxu1 %v2744_v61  ;;  %v908_v36 = vld [vmem:[%s4183_s9 + $0x38] sm:$0xff]  ;;  %v909_v61 = vld [vmem:[%s4183_s9 + $0x40] sm:$0xff]  ;;  %v1396_v10 = vld [vmem:[%s3375_s19 + $0x68] sm:$0xff] }
  0x34   : > { %2571 = vmatprep.subr.bf16.mxu0 %v515_v33  ;;  %944 = vperm.xlu1 %2716, %v906_v12   ;;  %v1792_v37 = vld [vmem:[%s4182_s8 + $0x78] sm:$0xff] }
  0x35   : > { %939 = vperm.xlu0 %2715, %v905_v13   ;;  %v912_v3 = vld [vmem:[%s4183_s9 + $0x58] sm:$0xff]  ;;  %v911_v13 = vld [vmem:[%s4183_s9 + $0x50] sm:$0xff] }
  0x36   : > { %1065 = vmatpush1.bf16.msra.mxu1 %v2742_v60  ;;  %v1394_v60 = vld [vmem:[%s3375_s19 + $0x58] sm:$0xff] }
  0x37   : > { %2572 = vmatpush3.bf16.msra.mxu0 %v515_v33  ;;  %1066 = vmatprep.subr.bf16.mxu1 %v2753_v0  ;;  %v1791_v33 = vld [vmem:[%s4182_s8 + $0x70] sm:$0xff]  ;;  %v1398_v11 = vld [vmem:[%s3375_s19 + $0x78] sm:$0xff] }
  0x38   : > { %2573 = vmatprep.subr.bf16.mxu0 %v516_v40  ;;  %1795 = vperm.xlu1 %2716, %v1777_v14  }
  0x39   : > { %2606 = vmatmul.mubr.msk.bf16.gmra.mrb[4].mxu1 %vm671_vm0, %v2722_v41  ;;  %949 = vperm.xlu0 %2715, %v907_v15  }
  0x3a   : > { %2609 = vmatprep.mubr.msk.bf16.mxu1 %vm671_vm0, %v2729_v42  ;;  %1067 = vmatpush1.bf16.msra.mxu1 %v2751_v1  ;;  %v1388_v42 = vld [vmem:[%s3375_s19 + $0x28] sm:$0xff] }
  0x3b   : > { %2574 = vmatpush3.bf16.msra.mxu0 %v516_v40  ;;  %1068 = vmatprep.subr.bf16.mxu1 %v2756_v7  ;;  %v1385_v40 = vld [vmem:[%s3375_s19 + $0x10] sm:$0xff] }
  0x3c   : > { %2575 = vmatprep.subr.bf16.mxu0 %v517_v43  ;;  %1805 = vperm.xlu1 %2716, %v1779_v16   ;;  %v1393_v7 = vld [vmem:[%s3375_s19 + $0x50] sm:$0xff] }
  0x3d   : > { %1800 = vperm.xlu0 %2715, %v1778_v17  }
  0x3e   : > { %1069 = vmatpush1.bf16.msra.mxu1 %v2754_v6  ;;  %v1391_v6 = vld [vmem:[%s3375_s19 + $0x40] sm:$0xff] }
  0x3f   : > { %2576 = vmatpush3.bf16.msra.mxu0 %v517_v43  ;;  %2617 = vmatprep.subr.bf16.mxu1 %v2738_v44  ;;  %v1390_v43 = vld [vmem:[%s3375_s19 + $0x38] sm:$0xff] }
  0x40   : > { %1487 = vmatprep.subr.bf16.mxu0 %v2738_v44  ;;  %1815 = vperm.xlu1 %2716, %v1781_v18  }
  0x41   : > { %2610 = vmatmul.mubr.msk.bf16.gmra.mrb[8].mxu1 %vm671_vm0, %v2730_v47  ;;  %1810 = vperm.xlu0 %2715, %v1780_v19   ;;  %v1399_v47 = vpack.c.bf16 %v1385_v40, %v1383_v39  ;;  %v1403_v19 = vpack.c.bf16 %v1393_v7, %v1391_v6  ;;  %v2763_v6 = vld [vmem:[%s4179_s5 + $0x30] sm:$0xff]  }
  0x42   : > { %2578 = vmatmul.mubr.bf16.vlgmr.msra.gmra.mrb[0].mxu0 %v2721_v45  ;;  %2613 = vmatprep.mubr.msk.bf16.mxu1 %vm671_vm0, %v2731_v48  ;;  %v910_v48 = vld [vmem:[%s4183_s9 + $0x48] sm:$0xff] }
  0x43   : > { %2581 = vmatprep.mubr.bf16.mxu0 %v2723_v46  ;;  %1488 = vmatpush1.bf16.msra.mxu0 %v3294_v49 }
  0x44   : > { %1489 = vmatprep.subr.bf16.mxu0 %v3321_v56  ;;  %1825 = vperm.xlu1 %2716, %v1783_v20  }
  0x45   : > { %1820 = vperm.xlu0 %2715, %v1782_v21  }
  0x47   : > { %1490 = vmatpush1.bf16.msra.mxu0 %v3326_v57 }
  0x48   : > { %1491 = vmatprep.subr.bf16.mxu0 %v3333_v58  ;;  %1835 = vperm.xlu1 %2716, %v1785_v22   ;;  %v914_v22 = vld [vmem:[%s4183_s9 + $0x68] sm:$0xff] }
  0x49   : > { %2614 = vmatmul.mubr.msk.bf16.gmra.mrb[12].mxu1 %vm671_vm0, %v2732_v52  ;;  %1830 = vperm.xlu0 %2715, %v1784_v23   ;;  %v1387_v52 = vld [vmem:[%s3375_s19 + $0x20] sm:$0xff]  ;;  %v1406_v23 = vpack.c.bf16 %v1398_v11, %v1396_v10 }
  0x4a   : > { %2582 = vmatmul.mubr.bf16.gmra.mrb[4].mxu0 %v2724_v50  ;;  %1094 = vmatprep.mubr.bf16.mxu1 %v3101_v2 }
  0x4b   : > { %2585 = vmatprep.mubr.bf16.mxu0 %v2725_v51  ;;  %1492 = vmatpush1.bf16.msra.mxu0 %v3338_v59  ;;  %v1402_v51 = vpack.c.bf16 %v1390_v43, %v1388_v42 }
  0x4c   : > { %1493 = vmatprep.subr.bf16.mxu0 %v3356_v63  ;;  %1845 = vperm.xlu1 %2716, %v1787_v24   ;;  %v1395_v24 = vld [vmem:[%s3375_s19 + $0x60] sm:$0xff] }
  0x4d   : > { %1840 = vperm.xlu0 %2715, %v1786_v25   ;;  %v1397_v25 = vld [vmem:[%s3375_s19 + $0x70] sm:$0xff] }
  0x4f   : > { %1494 = vmatpush1.bf16.msra.mxu0 %v3351_v62 }
  0x50   : > { %1664 = vmatprep.subr.bf16.mxu0 %v1400_v5  ;;  %1855 = vperm.xlu1 %2716, %v1789_v26  }
  0x51   : > { %1850 = vperm.xlu0 %2715, %v1788_v27   ;;  %v913_v27 = vld [vmem:[%s4183_s9 + $0x60] sm:$0xff] }
  0x52   : > { %2586 = vmatmul.mubr.bf16.gmra.mrb[8].mxu0 %v2726_v53  ;;  %v1389_v53 = vld [vmem:[%s3375_s19 + $0x30] sm:$0xff] }
  0x53   : > { %2589 = vmatprep.mubr.bf16.mxu0 %v2727_v54  ;;  %v1392_v54 = vld [vmem:[%s3375_s19 + $0x48] sm:$0xff]  ;;  %v1401_v1 = vpack.c.bf16 %v1389_v53, %v1387_v52  ;;  %s3731_s19 = scalar_lea.vmem [#allocation4], %s3697_s27  ;;  %s3027_s27 = scalar_lea.vmem %s3026_s22, 8192 }
  0x54   : > { %1865 = vperm.xlu1 %2716, %v1791_v33   ;;  %v1404_v5 = vpack.c.bf16 %v1394_v60, %v1392_v54  ;;  %v2758_v53 = vld [vmem:[%s4179_s5 + $0x8] sm:$0xff]   ;;  %s2241_s24 = sshll.u32 %s3731_s19, 4  ;;  %s4121_s24 = int_to_ptr.vmem [resolvable:$true] %s2241_s24 }
  0x55   : > { %1860 = vperm.xlu0 %2715, %v1790_v34   ;;  %s3021_s1 = scalar_lea.vmem %s4121_s24, 4096  ;;  %p3028_p1 = scmp.lt.s32.totalorder %s4121_s24, %s3026_s22 }
  0x56   : > { %p3022_p12 = scmp.ne.s32.totalorder %s4121_s24, %s3021_s1  ;;  %p3029_p2 = scmp.lt.s32.totalorder %s3027_s27, %s3021_s1 }
  0x58   : > { %954 = vperm.xlu1 %2716, %v908_v36   ;;  %p3023_p13 = pnand %p3022_p12, %p3200_p4  ;;  %p3030_p3 = por %p3029_p2, %p3028_p1 }
  0x59   : > { %1870 = vperm.xlu0 %2715, %v1792_v37  }
  0x5a   : > { %2590 = vmatmul.mubr.bf16.gmra.mrb[12].mxu0 %v2728_v55  ;;  %p3024_p0 = pneg %p3023_p13 }
  0x5b   : > { %1519 = vmatprep.mubr.bf16.mxu0 %v3101_v2 }
  0x5c   : > { %964 = vperm.xlu1 %2716, %v910_v48   ;;  %v2757_v48 = vld [vmem:[%s4179_s5] sm:$0xff]   ;;  %p3031_p5 = pnand %p3030_p3, %p3024_p0 }
  0x5d   : > { %959 = vperm.xlu0 %2715, %v909_v61  }
  0x60   : > { %974 = vperm.xlu1 %2716, %v912_v3  }
  0x61   : > { %969 = vperm.xlu0 %2715, %v911_v13  }
  0x64   : > { %984 = vperm.xlu1 %2716, %v914_v22  }
  0x65   : > { %979 = vperm.xlu0 %2715, %v913_v27  }
 0x104   : > { %v2603_v28 = vpop.f32.mrb[0].mxu1 }
 0x105   : > { %v806_v29 = vpop.f32.mrb[1].mxu1 }
 0x106   : > { %v2604_v30 = vpop.f32.mrb[2].mxu1 }
 0x107   : > { %v870_v31 = vpack.c.bf16 %v2604_v30, %v2603_v28  ;;  %v809_v32 = vpop.f32.mrb[3].mxu1  ;;  %v916_v30 = vld [vmem:[%s4183_s9 + $0x78] sm:$0xff] }
 0x108   : > { %v869_v35 = vpack.c.bf16 %v809_v32, %v806_v29  ;;  %v1405_v29 = vpack.c.bf16 %v1397_v25, %v1395_v24  ;;  %994 = vperm.xlu1 %2716, %v916_v30  }
 0x109   : > { %878 = vst.msk [vmem:[#allocation3 + $0x8] sm:$0xff] %vm671_vm0, %v870_v31 }
 0x10a   : > { %877 = vst.msk [vmem:[#allocation3] sm:$0xff] %vm671_vm0, %v869_v35  ;;  %v915_v35 = vld [vmem:[%s4183_s9 + $0x70] sm:$0xff] }
 0x10b   : > { %989 = vperm.xlu0 %2715, %v915_v35  }
 0x10c   : > { %v2607_v38 = vpop.f32.mrb[4].mxu1 }
 0x10d   : > { %v822_v41 = vpop.f32.mrb[5].mxu1 }
 0x10e   : > { %v2608_v44 = vpop.f32.mrb[6].mxu1 }
 0x10f   : > { %v872_v45 = vpack.c.bf16 %v2608_v44, %v2607_v38  ;;  %v825_v46 = vpop.f32.mrb[7].mxu1 }
 0x110   : > { %v871_v50 = vpack.c.bf16 %v825_v46, %v822_v41  ;;  %v1408_v18 = vld [vmem:[#allocation3 + $0x8] sm:$0xff] }
 0x111   : > { %v1407_v55 = vld [vmem:[#allocation3] sm:$0xff]  ;;  %880 = vst.msk [vmem:[#allocation3 + $0x18] sm:$0xff] %vm671_vm0, %v872_v45 }
 0x112   : > { %2468 = vmatmul.mubr.msk.bf16.vlgmr.msra.gmra.mrb[16].mxu0 %vm671_vm0, %v1407_v55  ;;  %879 = vst.msk [vmem:[#allocation3 + $0x10] sm:$0xff] %vm671_vm0, %v871_v50 }
 0x113   : > { %1529 = vmatprep.mubr.bf16.mxu0 %v3101_v2  ;;  %1665 = vmatpush1.bf16.msra.mxu0 %v1399_v47 }
 0x114   : > { %1666 = vmatprep.subr.bf16.mxu0 %v1402_v51  ;;  %v2611_v8 = vpop.f32.mrb[8].mxu1 }
 0x115   : > { %v2579_v0 = vpop.f32.mrb[0].mxu0  ;;  %v838_v12 = vpop.f32.mrb[9].mxu1 }
 0x116   : > { %v600_v4 = vpop.f32.mrb[1].mxu0  ;;  %v2612_v16 = vpop.f32.mrb[10].mxu1 }
 0x117   : > { %v2580_v9 = vpop.f32.mrb[2].mxu0  ;;  %1667 = vmatpush1.bf16.msra.mxu0 %v1401_v1  ;;  %v874_v20 = vpack.c.bf16 %v2612_v16, %v2611_v8  ;;  %v841_v21 = vpop.f32.mrb[11].mxu1  ;;  %v2761_v1 = vld [vmem:[%s4179_s5 + $0x20] sm:$0xff]   ;;  %v2764_v8 = vld [vmem:[%s4179_s5 + $0x38] sm:$0xff]  }
 0x118   : > { %v664_v14 = vpack.c.bf16 %v2580_v9, %v2579_v0  ;;  %v603_v15 = vpop.f32.mrb[3].mxu0  ;;  %1668 = vmatprep.subr.bf16.mxu0 %v1404_v5  ;;  %v873_v26 = vpack.c.bf16 %v841_v21, %v838_v12  ;;  %v1410_v9 = vld [vmem:[#allocation3 + $0x18] sm:$0xff] }
 0x119   : > { %v663_v17 = vpack.c.bf16 %v603_v15, %v600_v4  ;;  %882 = vst.msk [vmem:[#allocation3 + $0x28] sm:$0xff] %vm671_vm0, %v874_v20  ;;  %v1409_v39 = vld [vmem:[#allocation3 + $0x10] sm:$0xff]  ;;  %v2762_v4 = vld [vmem:[%s4179_s5 + $0x28] sm:$0xff]   ;;  %v930_v15 = vpop.permute.xlu1 %929 }
 0x11a   : > { %673 = vst.msk [vmem:[#allocation2 + $0x8] sm:$0xff] %vm671_vm0, %v664_v14  ;;  %2469 = vmatmul.mubr.msk.bf16.gmra.mrb[20].mxu0 %vm671_vm0, %v1408_v18  ;;  %881 = vst.msk [vmem:[#allocation3 + $0x20] sm:$0xff] %vm671_vm0, %v873_v26  ;;  %v920_v14 = vpop.permute.xlu0 %919 }
 0x11b   : > { %672 = vst.msk [vmem:[#allocation2] sm:$0xff] %vm671_vm0, %v663_v17  ;;  %1539 = vmatprep.mubr.bf16.mxu0 %v3101_v2  ;;  %1669 = vmatpush1.bf16.msra.mxu0 %v1403_v19 }
 0x11c   : > { %1670 = vmatprep.subr.bf16.mxu0 %v1406_v23  ;;  %v2615_v32 = vpop.f32.mrb[12].mxu1 }
 0x11d   : > { %v2583_v28 = vpop.f32.mrb[4].mxu0  ;;  %v854_v34 = vpop.f32.mrb[13].mxu1 }
 0x11e   : > { %v616_v31 = vpop.f32.mrb[5].mxu0  ;;  %v2616_v38 = vpop.f32.mrb[14].mxu1 }
 0x11f   : > { %v2584_v33 = vpop.f32.mrb[6].mxu0  ;;  %1671 = vmatpush1.bf16.msra.mxu0 %v1405_v29  ;;  %v876_v41 = vpack.c.bf16 %v2616_v38, %v2615_v32  ;;  %v857_v42 = vpop.f32.mrb[15].mxu1 }
 0x120   : > { %v666_v36 = vpack.c.bf16 %v2584_v33, %v2583_v28  ;;  %v619_v37 = vpop.f32.mrb[7].mxu0  ;;  %v875_v44 = vpack.c.bf16 %v857_v42, %v854_v34  ;;  %v1412_v11 = vld [vmem:[#allocation3 + $0x28] sm:$0xff]  ;;  %v925_v16 = vpop.permute.xlu0 %924 }
 0x121   : > { %v665_v40 = vpack.c.bf16 %v619_v37, %v616_v31  ;;  %884 = vst.msk [vmem:[#allocation3 + $0x38] sm:$0xff] %vm671_vm0, %v876_v41  ;;  %v886_v52 = vld [vmem:[#allocation2 + $0x8] sm:$0xff]  ;;  %v1411_v10 = vld [vmem:[#allocation3 + $0x20] sm:$0xff]  ;;  %v3588_v17 = vpop.permute.xlu1 %934 }
 0x122   : > { %v885_v43 = vld [vmem:[#allocation2] sm:$0xff]  ;;  %675 = vst.msk [vmem:[#allocation2 + $0x18] sm:$0xff] %vm671_vm0, %v666_v36  ;;  %2470 = vmatmul.mubr.msk.bf16.gmra.mrb[24].mxu0 %vm671_vm0, %v1409_v39  ;;  %883 = vst.msk [vmem:[#allocation3 + $0x30] sm:$0xff] %vm671_vm0, %v875_v44 }
 0x123   : > { %2420 = vmatmul.mubr.msk.bf16.vlgmr.msra.gmra.mrb[16].mxu1 %vm671_vm0, %v885_v43  ;;  %674 = vst.msk [vmem:[#allocation2 + $0x10] sm:$0xff] %vm671_vm0, %v665_v40  ;;  %1696 = vmatprep.mubr.bf16.mxu0 %v3101_v2 }
 0x124   : > { %2621 = vmatpush1.bf16.msra.mxu1 %v3294_v49  ;;  %1104 = vmatprep.mubr.bf16.mxu1 %v3101_v2  ;;  %v3590_v18 = vpop.permute.xlu0 %939 }
 0x125   : > { %v2587_v45 = vpop.f32.mrb[8].mxu0  ;;  %2618 = vmatprep.subr.bf16.mxu1 %v3321_v56  ;;  %v3592_v19 = vpop.permute.xlu1 %944 }
 0x126   : > { %v632_v46 = vpop.f32.mrb[9].mxu0 }
 0x127   : > { %v2588_v47 = vpop.f32.mrb[10].mxu0 }
 0x128   : > { %2622 = vmatpush1.bf16.msra.mxu1 %v3326_v57  ;;  %v668_v49 = vpack.c.bf16 %v2588_v47, %v2587_v45  ;;  %v635_v50 = vpop.f32.mrb[11].mxu0  ;;  %v1414_v13 = vld [vmem:[#allocation3 + $0x38] sm:$0xff]  ;;  %v3594_v20 = vpop.permute.xlu0 %949 }
 0x129   : > { %v667_v51 = vpack.c.bf16 %v635_v50, %v632_v46  ;;  %2619 = vmatprep.subr.bf16.mxu1 %v3333_v58  ;;  %v1413_v12 = vld [vmem:[#allocation3 + $0x30] sm:$0xff]  ;;  %v1796_v21 = vpop.permute.xlu1 %1795 }
 0x12a   : > { %677 = vst.msk [vmem:[#allocation2 + $0x28] sm:$0xff] %vm671_vm0, %v668_v49  ;;  %2484 = vmatmul.mubr.msk.bf16.vlgmr.msra.gmra.mrb[16].mxu0 %vm671_vm0, %v2757_v48  ;;  %v887_v61 = vld [vmem:[#allocation2 + $0x10] sm:$0xff] }
 0x12b   : > { %2421 = vmatmul.mubr.msk.bf16.gmra.mrb[20].mxu1 %vm671_vm0, %v886_v52  ;;  %676 = vst.msk [vmem:[#allocation2 + $0x20] sm:$0xff] %vm671_vm0, %v667_v51  ;;  %1706 = vmatprep.mubr.bf16.mxu0 %v3101_v2 }
 0x12c   : > { %1114 = vmatprep.mubr.bf16.mxu1 %v3101_v2  ;;  %2623 = vmatpush1.bf16.msra.mxu1 %v3338_v59  ;;  %v2759_v59 = vld [vmem:[%s4179_s5 + $0x10] sm:$0xff]   ;;  %v1801_v22 = vpop.permute.xlu0 %1800 }
 0x12d   : > { %v2591_v56 = vpop.f32.mrb[12].mxu0  ;;  %2620 = vmatprep.subr.bf16.mxu1 %v3356_v63  ;;  %v888_v63 = vld [vmem:[#allocation2 + $0x18] sm:$0xff]  ;;  %v3596_v23 = vpop.permute.xlu1 %1805 }
 0x12e   : > { %v648_v57 = vpop.f32.mrb[13].mxu0 }
 0x12f   : > { %v2592_v58 = vpop.f32.mrb[14].mxu0 }
 0x130   : > { %v670_v54 = vpack.c.bf16 %v2592_v58, %v2591_v56  ;;  %v651_v55 = vpop.f32.mrb[15].mxu0  ;;  %2624 = vmatpush1.bf16.msra.mxu1 %v3351_v62  ;;  %v2760_v62 = vld [vmem:[%s4179_s5 + $0x18] sm:$0xff]   ;;  %v3598_v24 = vpop.permute.xlu0 %1810 }
 0x131   : > { %v669_v60 = vpack.c.bf16 %v651_v55, %v648_v57  ;;  %v890_v3 = vld [vmem:[#allocation2 + $0x28] sm:$0xff]  ;;  %v3600_v27 = vpop.permute.xlu1 %1815 }
 0x132   : > { %679 = vst.msk [vmem:[#allocation2 + $0x38] sm:$0xff] %vm671_vm0, %v670_v54  ;;  %2485 = vmatmul.mubr.msk.bf16.gmra.mrb[20].mxu0 %vm671_vm0, %v2758_v53  ;;  %v889_v0 = vld [vmem:[#allocation2 + $0x20] sm:$0xff] }
 0x133   : > { %2422 = vmatmul.mubr.msk.bf16.gmra.mrb[24].mxu1 %vm671_vm0, %v887_v61  ;;  %678 = vst.msk [vmem:[#allocation2 + $0x30] sm:$0xff] %vm671_vm0, %v669_v60  ;;  %1716 = vmatprep.mubr.bf16.mxu0 %v3101_v2 }
 0x134   : > { %1124 = vmatprep.mubr.bf16.mxu1 %v3101_v2  ;;  %v3602_v30 = vpop.permute.xlu0 %1820 }
 0x135   : > { %v3604_v35 = vpop.permute.xlu1 %1825 }
 0x138   : > { %v3606_v37 = vpop.permute.xlu0 %1830 }
 0x139   : > { %v892_v7 = vld [vmem:[#allocation2 + $0x38] sm:$0xff]  ;;  %v3616_v53 = vpop.permute.xlu1 %1835 }
 0x13a   : > { %2486 = vmatmul.mubr.msk.bf16.gmra.mrb[24].mxu0 %vm671_vm0, %v2759_v59  ;;  %v891_v5 = vld [vmem:[#allocation2 + $0x30] sm:$0xff] }
 0x13b   : > { %2423 = vmatmul.mubr.msk.bf16.gmra.mrb[28].mxu1 %vm671_vm0, %v888_v63  ;;  %1726 = vmatprep.mubr.bf16.mxu0 %v3101_v2 }
 0x13c   : > { %1134 = vmatprep.mubr.bf16.mxu1 %v3101_v2  ;;  %v3621_v60 = vpop.permute.xlu0 %1840 }
 0x142   : > { %2487 = vmatmul.mubr.msk.bf16.gmra.mrb[28].mxu0 %vm671_vm0, %v2760_v62 }
 0x143   : > { %2424 = vmatmul.mubr.msk.bf16.gmra.mrb[32].mxu1 %vm671_vm0, %v889_v0  ;;  %1736 = vmatprep.mubr.bf16.mxu0 %v3101_v2 }
 0x144   : > { %1144 = vmatprep.mubr.bf16.mxu1 %v3101_v2 }
 0x14a   : > { %2488 = vmatmul.mubr.msk.bf16.gmra.mrb[32].mxu0 %vm671_vm0, %v2761_v1 }
 0x14b   : > { %2425 = vmatmul.mubr.msk.bf16.gmra.mrb[36].mxu1 %vm671_vm0, %v890_v3  ;;  %1746 = vmatprep.mubr.bf16.mxu0 %v3101_v2 }
 0x14c   : > { %1154 = vmatprep.mubr.bf16.mxu1 %v3101_v2 }
 0x152   : > { %2489 = vmatmul.mubr.msk.bf16.gmra.mrb[36].mxu0 %vm671_vm0, %v2762_v4 }
 0x153   : > { %2426 = vmatmul.mubr.msk.bf16.gmra.mrb[40].mxu1 %vm671_vm0, %v891_v5  ;;  %1756 = vmatprep.mubr.bf16.mxu0 %v3101_v2 }
 0x154   : > { %1164 = vmatprep.mubr.bf16.mxu1 %v3101_v2 }
 0x15a   : > { %2490 = vmatmul.mubr.msk.bf16.gmra.mrb[40].mxu0 %vm671_vm0, %v2763_v6 }
 0x15b   : > { %2427 = vmatmul.mubr.msk.bf16.gmra.mrb[44].mxu1 %vm671_vm0, %v892_v7  ;;  %1766 = vmatprep.mubr.bf16.mxu0 %v3101_v2 }
 0x15c   : > { %1549 = vmatprep.mubr.bf16.mxu1 %v3101_v2 }
 0x162   : > { %2491 = vmatmul.mubr.msk.bf16.gmra.mrb[44].mxu0 %vm671_vm0, %v2764_v8 }
 0x163   : > { %2471 = vmatmul.mubr.msk.bf16.vlgmr.msra.gmra.mrb[48].mxu1 %vm671_vm0, %v1410_v9 }
 0x164   : > { %1559 = vmatprep.mubr.bf16.mxu1 %v3101_v2 }
 0x16b   : > { %2472 = vmatmul.mubr.msk.bf16.gmra.mrb[52].mxu1 %vm671_vm0, %v1411_v10 }
 0x16c   : > { %1569 = vmatprep.mubr.bf16.mxu1 %v3101_v2 }
 0x173   : > { %2473 = vmatmul.mubr.msk.bf16.gmra.mrb[56].mxu1 %vm671_vm0, %v1412_v11 }
 0x174   : > { %1579 = vmatprep.mubr.bf16.mxu1 %v3101_v2 }
 0x17b   : > { %2474 = vmatmul.mubr.msk.bf16.gmra.mrb[60].mxu1 %vm671_vm0, %v1413_v12 }
 0x17c   : > { %1589 = vmatprep.mubr.bf16.mxu1 %v3101_v2 }
 0x183   : > { %2475 = vmatmul.mubr.msk.bf16.gmra.mrb[64].mxu1 %vm671_vm0, %v1414_v13 }
 0x1f6   : > { %v1096_v2 = vpop.f32.mrb[16].mxu1 }
 0x1f7   : > { %v1097_v25 = vadd.f32 %v1096_v2, %v920_v14  ;;  %v1098_v26 = vpop.f32.mrb[17].mxu1  ;;  %v3638_v2 = vpop.permute.xlu0 %1850 }
 0x1f8   : > { %v1099_v28 = vadd.f32 %v1098_v26, %v920_v14  ;;  %v1100_v29 = vpop.f32.mrb[18].mxu1  ;;  %4198 = vst [vmem:[#allocation8_spill] sm:$0xff] %v3638_v2 }
 0x1f9   : > { %v1102_v31 = vpop.f32.mrb[19].mxu1  ;;  %v2428_v32 = vmul.f32 -1.442695, %v1097_v25  ;;  %v1101_v34 = vadd.f32 %v1100_v29, %v925_v16 }
 0x1fa   : > { %v2429_v33 = vmul.f32 -1.442695, %v1099_v28  ;;  %v1103_v38 = vadd.f32 %v1102_v31, %v925_v16 }
 0x1fb   : > { %2765 = vpow2.f32 %v2428_v32  ;;  %v2430_v44 = vmul.f32 -1.442695, %v1101_v34 }
 0x1fc   : > { %2767 = vpow2.f32 %v2429_v33  ;;  %v2431_v51 = vmul.f32 -1.442695, %v1103_v38 }
 0x1fd   : > { %v1698_v39 = vpop.f32.mrb[16].mxu0 }
 0x1fe   : > { %v1106_v36 = vpop.f32.mrb[20].mxu1  ;;  %v3608_v41 = vadd.f32 %v1796_v21, %v1698_v39  ;;  %v1700_v42 = vpop.f32.mrb[17].mxu0 }
 0x1ff   : > { %v1108_v40 = vpop.f32.mrb[21].mxu1  ;;  %v1107_v45 = vadd.f32 %v1106_v36, %v930_v15  ;;  %v3610_v46 = vadd.f32 %v1796_v21, %v1700_v42  ;;  %v1702_v47 = vpop.f32.mrb[18].mxu0 }
 0x200   : > { %v1110_v43 = vpop.f32.mrb[22].mxu1  ;;  %v2492_v49 = vmul.f32 -1.442695, %v3608_v41  ;;  %v1704_v50 = vpop.f32.mrb[19].mxu0  ;;  %v1109_v52 = vadd.f32 %v1108_v40, %v930_v15  ;;  %v3614_v57 = vadd.f32 %v1801_v22, %v1702_v47 }
 0x201   : > { %v1112_v48 = vpop.f32.mrb[23].mxu1  ;;  %v2493_v56 = vmul.f32 -1.442695, %v3610_v46  ;;  %v2432_v58 = vmul.f32 -1.442695, %v1107_v45  ;;  %v1111_v54 = vadd.f32 %v1110_v43, %v3588_v17  ;;  %v3619_v55 = vadd.f32 %v1801_v22, %v1704_v50  ;;  %v3633_v15 = vpop.permute.xlu1 %1845 }
 0x202   : > { %2769 = vpow2.f32 %v2492_v49  ;;  %v2433_v59 = vmul.f32 -1.442695, %v1109_v52  ;;  %v2494_v1 = vmul.f32 -1.442695, %v3614_v57  ;;  %v1113_v9 = vadd.f32 %v1112_v48, %v3588_v17  ;;  %4197 = vst [vmem:[#allocation7_spill] sm:$0xff] %v3633_v15 }
 0x203   : > { %2771 = vpow2.f32 %v2430_v44  ;;  %v2434_v6 = vmul.f32 -1.442695, %v1111_v54  ;;  %v2495_v10 = vmul.f32 -1.442695, %v3619_v55 }
 0x204   : > { %2773 = vpow2.f32 %v2493_v56  ;;  %v2435_v22 = vmul.f32 -1.442695, %v1113_v9 }
 0x205   : > { %2775 = vpow2.f32 %v2431_v51  ;;  %v1708_v63 = vpop.f32.mrb[20].mxu0  ;;  %v2766_v0 = vpop.eup %2765 }
 0x206   : > { %v1116_v61 = vpop.f32.mrb[24].mxu1  ;;  %v1710_v3 = vpop.f32.mrb[21].mxu0  ;;  %2777 = vpow2.f32 %v2432_v58  ;;  %v1271_v12 = vadd.f32 1.0, %v2766_v0  ;;  %v3636_v16 = vadd.f32 %v3596_v23, %v1708_v63 }
 0x207   : > { %v3623_v62 = vpop.f32.mrb[25].mxu1  ;;  %v2768_v5 = vpop.eup %2767  ;;  %2779 = vpow2.f32 %v2433_v59  ;;  %v1117_v14 = vadd.f32 %v1116_v61, %v3590_v18  ;;  %v3643_v28 = vadd.f32 %v3596_v23, %v1710_v3 }
 0x208   : > { %v3626_v4 = vpop.f32.mrb[26].mxu1  ;;  %v1712_v7 = vpop.f32.mrb[22].mxu0  ;;  %v1272_v13 = vadd.f32 1.0, %v2768_v5  ;;  %2781 = vpow2.f32 %v2494_v1  ;;  %v2496_v40 = vmul.f32 -1.442695, %v3636_v16 }
 0x209   : > { %v3628_v8 = vpop.f32.mrb[27].mxu1  ;;  %v1714_v11 = vpop.f32.mrb[23].mxu0  ;;  %2783 = vpow2.f32 %v2434_v6  ;;  %v2436_v33 = vmul.f32 -1.442695, %v1117_v14  ;;  %v2497_v47 = vmul.f32 -1.442695, %v3643_v28  ;;  %v3662_v51 = vadd.f32 %v3598_v24, %v1712_v7 }
 0x20a   : > { %2785 = vpow2.f32 %v2495_v10  ;;  %v3659_v50 = vpop.permute.xlu1 %1855  ;;  %v3664_v58 = vpop.permute.xlu0 %1860  ;;  %v3669_v63 = vadd.f32 %v3598_v24, %v1714_v11  ;;  %v1119_v6 = vadd.f32 %v3623_v62, %v3590_v18 }
 0x20b   : > { %2787 = vrcp.f32 %v1271_v12  ;;  %4199 = vst [vmem:[#allocation9_spill] sm:$0xff] %v3659_v50  ;;  %4200 = vst [vmem:[#allocation10_spill] sm:$0xff] %v3664_v58  ;;  %v2498_v11 = vmul.f32 -1.442695, %v3662_v51 }
 0x20c   : > { %v2770_v21 = vpop.eup %2769  ;;  %2789 = vrcp.f32 %v1272_v13 }
 0x20d   : > { %v2772_v25 = vpop.eup %2771  ;;  %v2001_v26 = vadd.f32 1.0, %v2770_v21  ;;  %v1718_v29 = vpop.f32.mrb[24].mxu0 }
 0x20e   : > { %v3640_v17 = vpop.f32.mrb[28].mxu1  ;;  %v2774_v32 = vpop.eup %2773  ;;  %v1273_v23 = vadd.f32 1.0, %v2772_v25  ;;  %v3684_v12 = vadd.f32 %v3600_v27, %v1718_v29  ;;  %v1121_v25 = vadd.f32 %v3626_v4, %v3592_v19 }
 0x20f   : > { %v3645_v31 = vpop.f32.mrb[29].mxu1  ;;  %v3647_v34 = vpop.f32.mrb[25].mxu0  ;;  %2791 = vrcp.f32 %v2001_v26  ;;  %v2002_v39 = vadd.f32 1.0, %v2774_v32  ;;  %v2499_v26 = vmul.f32 -1.442695, %v3669_v63 }
 0x210   : > { %v3649_v36 = vpop.f32.mrb[30].mxu1  ;;  %v2776_v38 = vpop.eup %2775  ;;  %2793 = vpow2.f32 %v2435_v22 }
 0x211   : > { %v3652_v42 = vpop.f32.mrb[26].mxu0  ;;  %v3654_v43 = vpop.f32.mrb[31].mxu1  ;;  %2795 = vrcp.f32 %v2002_v39  ;;  %v1274_v48 = vadd.f32 1.0, %v2776_v38 }
 0x212   : > { %v3656_v44 = vpop.f32.mrb[27].mxu0  ;;  %v2778_v45 = vpop.eup %2777  ;;  %2797 = vpow2.f32 %v2436_v33  ;;  %v2437_v33 = vmul.f32 -1.442695, %v1119_v6 }
 0x213   : > { %v2780_v49 = vpop.eup %2779  ;;  %2799 = vpow2.f32 %v2496_v40  ;;  %v1275_v56 = vadd.f32 1.0, %v2778_v45  ;;  %v3700_v39 = vpop.permute.xlu1 %1865  ;;  %v2500_v40 = vmul.f32 -1.442695, %v3684_v12 }
 0x214   : > { %v2782_v52 = vpop.eup %2781  ;;  %2801 = vrcp.f32 %v1273_v23  ;;  %v1276_v5 = vadd.f32 1.0, %v2780_v49  ;;  %4201 = vst [vmem:[#allocation11_spill] sm:$0xff] %v3700_v39 }
 0x215   : > { %v2784_v61 = vpop.eup %2783  ;;  %v2003_v59 = vadd.f32 1.0, %v2782_v52  ;;  %2803 = vpow2.f32 %v2497_v47  ;;  %v3673_v1 = vpop.f32.mrb[28].mxu0  ;;  %v2438_v52 = vmul.f32 -1.442695, %v1121_v25 }
 0x216   : > { %v3666_v54 = vpop.f32.mrb[32].mxu1  ;;  %v2786_v3 = vpop.eup %2785  ;;  %2805 = vrcp.f32 %v1274_v48  ;;  %v1277_v18 = vadd.f32 1.0, %v2784_v61 }
 0x217   : > { %v3671_v0 = vpop.f32.mrb[33].mxu1  ;;  %v3679_v9 = vpop.f32.mrb[29].mxu0  ;;  %2807 = vrcp.f32 %v2003_v59  ;;  %v2004_v24 = vadd.f32 1.0, %v2786_v3 }
 0x218   : > { %v3677_v7 = vpop.f32.mrb[34].mxu1  ;;  %v2788_v10 = vpop.eup %2787  ;;  %2809 = vrcp.f32 %v1275_v56  ;;  %v3712_v56 = vadd.f32 %v3600_v27, %v3647_v34  ;;  %v3724_v27 = vadd.f32 %v3602_v30, %v3652_v42  ;;  %v1127_v42 = vadd.f32 %v3640_v17, %v3594_v20 }
 0x219   : > { %v3686_v13 = vpop.f32.mrb[35].mxu1  ;;  %v3688_v14 = vpop.f32.mrb[30].mxu0  ;;  %2811 = vrcp.f32 %v2004_v24 }
 0x21a   : > { %v2790_v21 = vpop.eup %2789  ;;  %v3690_v62 = vpop.f32.mrb[31].mxu0  ;;  %2813 = vrcp.f32 %v1276_v5 }
 0x21b   : > { %v2792_v22 = vpop.eup %2791  ;;  %2815 = vpow2.f32 %v2498_v11  ;;  %v3704_v47 = vpop.permute.xlu0 %1870 }
 0x21c   : > { %v2794_v32 = vpop.eup %2793  ;;  %v2097_v29 = vmul.f32 %v2792_v22, %v3608_v41  ;;  %2817 = vrcp.f32 %v1277_v18  ;;  %4202 = vst [vmem:[#allocation12_spill] sm:$0xff] %v3704_v47  ;;  %v1123_v41 = vadd.f32 %v3628_v8, %v3592_v19 }
 0x21d   : > { %v2796_v38 = vpop.eup %2795  ;;  %2819 = vpow2.f32 %v2499_v26  ;;  %v3716_v59 = vpop.f32.mrb[32].mxu0  ;;  %v1278_v8 = vadd.f32 1.0, %v2794_v32 }
 0x21e   : > { %v2798_v23 = vpop.eup %2797  ;;  %v2129_v45 = vmul.f32 %v2788_v10, %v2097_v29  ;;  %v2098_v4 = vmul.f32 %v2796_v38, %v3610_v46  ;;  %v3706_v48 = vpop.f32.mrb[36].mxu1  ;;  %2821 = vpow2.f32 %v2437_v33  ;;  %v2501_v33 = vmul.f32 -1.442695, %v3712_v56 }
 0x21f   : > { %v2800_v49 = vpop.eup %2799  ;;  %v3714_v61 = vpop.f32.mrb[37].mxu1  ;;  %2823 = vpow2.f32 %v2500_v40  ;;  %v1279_v25 = vadd.f32 1.0, %v2798_v23 }
 0x220   : > { %v2802_v46 = vpop.eup %2801  ;;  %v2161_v3 = vadd.f32 %v2788_v10, %v2129_v45  ;;  %v2130_v5 = vmul.f32 %v2790_v21, %v2098_v4  ;;  %v2005_v6 = vadd.f32 1.0, %v2800_v49  ;;  %v3718_v24 = vpop.f32.mrb[38].mxu1  ;;  %v2439_v45 = vmul.f32 -1.442695, %v1123_v41 }
 0x221   : > { %v3720_v11 = vpop.f32.mrb[33].mxu0  ;;  %v2804_v19 = vpop.eup %2803  ;;  %v1129_v4 = vadd.f32 %v3645_v31, %v3594_v20  ;;  %v2502_v49 = vmul.f32 -1.442695, %v3724_v27 }
 0x222   : > { %v3726_v34 = vpop.f32.mrb[39].mxu1  ;;  %v3728_v18 = vpop.f32.mrb[34].mxu0  ;;  %2193 = vst [vmem:[%s3731_s19] sm:$0xff] %v2161_v3  ;;  %v2162_v10 = vadd.f32 %v2790_v21, %v2130_v5  ;;  %2825 = vrcp.f32 %v2005_v6  ;;  %v2006_v26 = vadd.f32 1.0, %v2804_v19  ;;  %v2440_v19 = vmul.f32 -1.442695, %v1127_v42 }
 0x223   : > { %v2806_v22 = vpop.eup %2805  ;;  %v3734_v32 = vpop.f32.mrb[35].mxu0  ;;  %2827 = vpow2.f32 %v2438_v52 }
 0x224   : > { %v2808_v29 = vpop.eup %2807  ;;  %2194 = vst [vmem:[%s3731_s19 + $0x8] sm:$0xff] %v2162_v10  ;;  %2829 = vrcp.f32 %v2006_v26  ;;  %v955_v21 = vpop.permute.xlu1 %954 }
 0x225   : > { %v3739_v38 = vpop.eup %2809  ;;  %v2099_v40 = vmul.f32 %v2808_v29, %v3614_v57  ;;  %2831 = vrcp.f32 %v1278_v8  ;;  %v960_v5 = vpop.permute.xlu0 %959  ;;  %v1131_v41 = vadd.f32 %v3649_v36, %v955_v21  ;;  %v3754_v8 = vadd.f32 %v3602_v30, %v3656_v44 }
 0x226   : > { %v2812_v23 = vpop.eup %2811  ;;  %2833 = vrcp.f32 %v1279_v25  ;;  %v3749_v6 = vpop.f32.mrb[40].mxu1  ;;  %v1133_v30 = vadd.f32 %v3654_v43, %v955_v21 }
 0x227   : > { %v3746_v52 = vpop.eup %2813  ;;  %v2131_v17 = vmul.f32 %v2802_v46, %v2099_v40  ;;  %v2100_v3 = vmul.f32 %v2812_v23, %v3619_v55  ;;  %2835 = vpow2.f32 %v2501_v33  ;;  %v3756_v20 = vpop.f32.mrb[41].mxu1  ;;  %v2441_v33 = vmul.f32 -1.442695, %v1129_v4 }
 0x228   : > { %v2816_v57 = vpop.eup %2815  ;;  %v3758_v31 = vpop.f32.mrb[36].mxu0  ;;  %2837 = vpow2.f32 %v2439_v45  ;;  %v1137_v45 = vadd.f32 %v3666_v54, %v960_v5  ;;  %v2442_v4 = vmul.f32 -1.442695, %v1131_v41  ;;  %v2503_v21 = vmul.f32 -1.442695, %v3754_v8 }
 0x229   : > { %v3760_v10 = vpop.eup %2817  ;;  %v2163_v55 = vadd.f32 %v2802_v46, %v2131_v17  ;;  %v2132_v25 = vmul.f32 %v2806_v22, %v2100_v3  ;;  %v2007_v26 = vadd.f32 1.0, %v2816_v57  ;;  %v3762_v29 = vpop.f32.mrb[42].mxu1  ;;  %2839 = vpow2.f32 %v2502_v49 }
 0x22a   : > { %v3764_v42 = vpop.f32.mrb[37].mxu0  ;;  %v2820_v36 = vpop.eup %2819  ;;  %v1139_v49 = vadd.f32 %v3671_v0, %v960_v5 }
 0x22b   : > { %v3767_v44 = vpop.f32.mrb[43].mxu1  ;;  %v3769_v40 = vpop.f32.mrb[38].mxu0  ;;  %2195 = vst [vmem:[%s3731_s19 + $0x10] sm:$0xff] %v2163_v55  ;;  %v2164_v46 = vadd.f32 %v2806_v22, %v2132_v25  ;;  %2841 = vrcp.f32 %v2007_v26  ;;  %v2008_v17 = vadd.f32 1.0, %v2820_v36  ;;  %v2443_v55 = vmul.f32 -1.442695, %v1133_v30 }
 0x22c   : > { %v2822_v23 = vpop.eup %2821  ;;  %v3773_v3 = vpop.f32.mrb[39].mxu0  ;;  %2843 = vpow2.f32 %v2440_v19  ;;  %v2444_v26 = vmul.f32 -1.442695, %v1137_v45 }
 0x22d   : > { %v2824_v57 = vpop.eup %2823  ;;  %2196 = vst [vmem:[%s3731_s19 + $0x18] sm:$0xff] %v2164_v46  ;;  %2845 = vrcp.f32 %v2008_v17  ;;  %v965_v25 = vpop.permute.xlu1 %964  ;;  %v2445_v46 = vmul.f32 -1.442695, %v1139_v49 }
 0x22e   : > { %v2826_v47 = vpop.eup %2825  ;;  %v2009_v43 = vadd.f32 1.0, %v2824_v57  ;;  %2847 = vpow2.f32 %v2441_v33  ;;  %v970_v36 = vpop.permute.xlu0 %969  ;;  %v1141_v33 = vadd.f32 %v3677_v7, %v965_v25  ;;  %v1143_v30 = vadd.f32 %v3686_v13, %v965_v25 }
 0x22f   : > { %v2828_v39 = vpop.eup %2827  ;;  %v2101_v22 = vmul.f32 %v2826_v47, %v3636_v16  ;;  %v3779_v19 = vpop.f32.mrb[44].mxu1  ;;  %v1147_v13 = vadd.f32 %v3706_v48, %v970_v36  ;;  %v1149_v25 = vadd.f32 %v3714_v61, %v970_v36 }
 0x230   : > { %v2830_v54 = vpop.eup %2829  ;;  %2849 = vrcp.f32 %v2009_v43  ;;  %v3785_v17 = vpop.f32.mrb[45].mxu1  ;;  %v2446_v2 = vmul.f32 -1.442695, %v1141_v33  ;;  %v2447_v61 = vmul.f32 -1.442695, %v1143_v30 }
 0x231   : > { %v3781_v41 = vpop.eup %2831  ;;  %v2133_v0 = vmul.f32 %v3739_v38, %v2101_v22  ;;  %v2102_v5 = vmul.f32 %v2830_v54, %v3643_v28  ;;  %2851 = vpow2.f32 %v2442_v4  ;;  %v3787_v16 = vpop.f32.mrb[40].mxu0  ;;  %v1280_v4 = vadd.f32 1.0, %v2822_v23 }
 0x232   : > { %v3789_v47 = vpop.eup %2833  ;;  %2853 = vpow2.f32 %v2503_v21  ;;  %v3793_v45 = vpop.f32.mrb[46].mxu1  ;;  %v1281_v23 = vadd.f32 1.0, %v2828_v39  ;;  %v2449_v15 = vmul.f32 -1.442695, %v1149_v25 }
 0x233   : > { %v3795_v57 = vpop.f32.mrb[41].mxu0  ;;  %v2836_v43 = vpop.eup %2835  ;;  %v2165_v28 = vadd.f32 %v3739_v38, %v2133_v0  ;;  %v2134_v49 = vmul.f32 %v3746_v52, %v2102_v5  ;;  %2855 = vpow2.f32 %v2443_v55 }
 0x234   : > { %v3799_v22 = vpop.f32.mrb[47].mxu1  ;;  %v3801_v54 = vpop.f32.mrb[42].mxu0  ;;  %v2010_v7 = vadd.f32 1.0, %v2836_v43  ;;  %2857 = vpow2.f32 %v2444_v26 }
 0x235   : > { %v2838_v21 = vpop.eup %2837  ;;  %v3805_v58 = vpop.f32.mrb[43].mxu0  ;;  %2197 = vst [vmem:[%s3731_s19 + $0x20] sm:$0xff] %v2165_v28  ;;  %v2166_v38 = vadd.f32 %v3746_v52, %v2134_v49  ;;  %2859 = vpow2.f32 %v2445_v46  ;;  %v2448_v28 = vmul.f32 -1.442695, %v1147_v13 }
 0x236   : > { %v2840_v50 = vpop.eup %2839  ;;  %v975_v55 = vpop.permute.xlu1 %974  ;;  %2861 = vrcp.f32 %v2010_v7 }
 0x237   : > { %v2842_v0 = vpop.eup %2841  ;;  %v2011_v5 = vadd.f32 1.0, %v2840_v50  ;;  %v1151_v26 = vadd.f32 %v3718_v24, %v975_v55  ;;  %2863 = vrcp.f32 %v1280_v4  ;;  %2198 = vst [vmem:[%s3731_s19 + $0x28] sm:$0xff] %v2166_v38  ;;  %v1551_v52 = vpop.f32.mrb[48].mxu1 }
 0x238   : > { %v2844_v43 = vpop.eup %2843  ;;  %v2103_v48 = vmul.f32 %v2842_v0, %v3662_v51  ;;  %v3815_v33 = vadd.f32 %v3673_v1, %v1551_v52  ;;  %v1553_v24 = vpop.f32.mrb[49].mxu1 }
 0x239   : > { %v2846_v36 = vpop.eup %2845  ;;  %2865 = vrcp.f32 %v2011_v5  ;;  %v3817_v4 = vpop.f32.mrb[44].mxu0  ;;  %v2450_v51 = vmul.f32 -1.442695, %v1151_v26  ;;  %v3820_v30 = vadd.f32 %v3679_v9, %v1553_v24  ;;  %v1282_v5 = vadd.f32 1.0, %v2838_v21 }
 0x23a   : > { %v2848_v39 = vpop.eup %2847  ;;  %2867 = vrcp.f32 %v1281_v23  ;;  %v2135_v46 = vmul.f32 %v3760_v10, %v2103_v48  ;;  %v2104_v50 = vmul.f32 %v2846_v36, %v3669_v63  ;;  %v1555_v7 = vpop.f32.mrb[50].mxu1 }
 0x23b   : > { %v2850_v49 = vpop.eup %2849  ;;  %2869 = vpow2.f32 %v2446_v2  ;;  %v3822_v13 = vpop.f32.mrb[45].mxu0  ;;  %v3838_v24 = vadd.f32 %v3688_v14, %v1555_v7 }
 0x23c   : > { %v2852_v25 = vpop.eup %2851  ;;  %v2167_v38 = vadd.f32 %v3760_v10, %v2135_v46  ;;  %v2136_v63 = vmul.f32 %v3781_v41, %v2104_v50  ;;  %v2105_v1 = vmul.f32 %v2850_v49, %v3684_v12  ;;  %2871 = vpow2.f32 %v2447_v61  ;;  %v1557_v23 = vpop.f32.mrb[51].mxu1 }
 0x23d   : > { %v3827_v0 = vpop.f32.mrb[46].mxu0  ;;  %v2854_v2 = vpop.eup %2853  ;;  %2873 = vpow2.f32 %v2448_v28  ;;  %v1283_v12 = vadd.f32 1.0, %v2844_v43  ;;  %v1153_v61 = vadd.f32 %v3726_v34, %v975_v55  ;;  %v1284_v28 = vadd.f32 1.0, %v2848_v39 }
 0x23e   : > { %v3829_v9 = vpop.f32.mrb[47].mxu0  ;;  %v2856_v26 = vpop.eup %2855  ;;  %2199 = vst [vmem:[%s3731_s19 + $0x30] sm:$0xff] %v2167_v38  ;;  %v2168_v48 = vadd.f32 %v3781_v41, %v2136_v63  ;;  %v2137_v10 = vmul.f32 %v3789_v47, %v2105_v1  ;;  %v2012_v36 = vadd.f32 1.0, %v2854_v2  ;;  %2875 = vpow2.f32 %v2449_v15 }
 0x23f   : > { %v2858_v52 = vpop.eup %2857  ;;  %2877 = vpow2.f32 %v2450_v51  ;;  %v980_v50 = vpop.permute.xlu0 %979  ;;  %v1285_v49 = vadd.f32 1.0, %v2852_v25  ;;  %v3843_v51 = vadd.f32 %v3690_v62, %v1557_v23  ;;  %v1286_v39 = vadd.f32 1.0, %v2856_v26 }
 0x240   : > { %v2860_v46 = vpop.eup %2859  ;;  %2200 = vst [vmem:[%s3731_s19 + $0x38] sm:$0xff] %v2168_v48  ;;  %v2169_v21 = vadd.f32 %v3789_v47, %v2137_v10  ;;  %2879 = vrcp.f32 %v2012_v36  ;;  %v1157_v15 = vadd.f32 %v3749_v6, %v980_v50  ;;  %v1159_v43 = vadd.f32 %v3756_v20, %v980_v50  ;;  %v1561_v34 = vpop.f32.mrb[52].mxu1 }
 0x241   : > { %v2862_v41 = vpop.eup %2861  ;;  %2881 = vrcp.f32 %v1282_v5  ;;  %v985_v38 = vpop.permute.xlu1 %984  ;;  %v3848_v14 = vadd.f32 %v3716_v59, %v1561_v34  ;;  %v1287_v6 = vadd.f32 1.0, %v2858_v52  ;;  %v1288_v2 = vadd.f32 1.0, %v2860_v46 }
 0x242   : > { %v2864_v55 = vpop.eup %2863  ;;  %2201 = vst [vmem:[%s3731_s19 + $0x40] sm:$0xff] %v2169_v21  ;;  %v2106_v47 = vmul.f32 %v2862_v41, %v3712_v56  ;;  %v1563_v7 = vpop.f32.mrb[53].mxu1  ;;  %2883 = vrcp.f32 %v1283_v12  ;;  %v1161_v20 = vadd.f32 %v3762_v29, %v985_v38  ;;  %v2451_v26 = vmul.f32 -1.442695, %v1153_v61 }
 0x243   : > { %v2866_v25 = vpop.eup %2865  ;;  %v3852_v62 = vadd.f32 %v3720_v11, %v1563_v7  ;;  %v1565_v63 = vpop.f32.mrb[54].mxu1  ;;  %2885 = vrcp.f32 %v1284_v28  ;;  %v2452_v29 = vmul.f32 -1.442695, %v1157_v15  ;;  %v2453_v11 = vmul.f32 -1.442695, %v1159_v43 }
 0x244   : > { %v2868_v1 = vpop.eup %2867  ;;  %v2138_v23 = vmul.f32 %v2864_v55, %v2106_v47  ;;  %v2107_v56 = vmul.f32 %v2866_v25, %v3724_v27  ;;  %v1567_v5 = vpop.f32.mrb[55].mxu1  ;;  %2887 = vrcp.f32 %v1285_v49  ;;  %v2454_v28 = vmul.f32 -1.442695, %v1161_v20 }
 0x245   : > { %v2870_v59 = vpop.eup %2869  ;;  %2889 = vrcp.f32 %v1286_v39  ;;  %v3857_v27 = vadd.f32 %v3728_v18, %v1565_v63  ;;  %v990_v61 = vpop.permute.xlu0 %989  ;;  %v1163_v41 = vadd.f32 %v3767_v44, %v985_v38  ;;  %v3861_v49 = vadd.f32 %v3734_v32, %v1567_v5 }
 0x246   : > { %v2872_v48 = vpop.eup %2871  ;;  %v2170_v10 = vadd.f32 %v2864_v55, %v2138_v23  ;;  %v2139_v36 = vmul.f32 %v2868_v1, %v2107_v56  ;;  %2891 = vrcp.f32 %v1287_v6  ;;  %v1289_v50 = vadd.f32 1.0, %v2870_v59  ;;  %v1571_v15 = vpop.f32.mrb[56].mxu1 }
 0x247   : > { %v2874_v52 = vpop.eup %2873  ;;  %2893 = vrcp.f32 %v1288_v2  ;;  %v1290_v43 = vadd.f32 1.0, %v2872_v48  ;;  %v1167_v55 = vadd.f32 %v3779_v19, %v990_v61  ;;  %v3866_v47 = vadd.f32 %v3758_v31, %v1571_v15  ;;  %v1573_v18 = vpop.f32.mrb[57].mxu1 }
 0x248   : > { %v2876_v12 = vpop.eup %2875  ;;  %2202 = vst [vmem:[%s3731_s19 + $0x48] sm:$0xff] %v2170_v10  ;;  %v2171_v21 = vadd.f32 %v2868_v1, %v2139_v36  ;;  %2895 = vpow2.f32 %v2451_v26  ;;  %v1291_v7 = vadd.f32 1.0, %v2874_v52  ;;  %v3870_v44 = vadd.f32 %v3764_v42, %v1573_v18  ;;  %v1575_v32 = vpop.f32.mrb[58].mxu1 }
 0x249   : > { %v2878_v46 = vpop.eup %2877  ;;  %2897 = vpow2.f32 %v2452_v29  ;;  %v1292_v25 = vadd.f32 1.0, %v2876_v12  ;;  %v1169_v6 = vadd.f32 %v3785_v17, %v990_v61  ;;  %v3874_v20 = vadd.f32 %v3769_v40, %v1575_v32  ;;  %v1577_v19 = vpop.f32.mrb[59].mxu1 }
 0x24a   : > { %v2880_v34 = vpop.eup %2879  ;;  %2203 = vst [vmem:[%s3731_s19 + $0x50] sm:$0xff] %v2171_v21  ;;  %2899 = vpow2.f32 %v2453_v11  ;;  %v3880_v1 = vadd.f32 %v3604_v35, %v3815_v33  ;;  %v2455_v23 = vmul.f32 -1.442695, %v1163_v41  ;;  %v3886_v17 = vadd.f32 %v3604_v35, %v3820_v30  ;;  %v995_v59 = vpop.permute.xlu1 %994 }
 0x24b   : > { %v2108_v39 = vmul.f32 %v2880_v34, %v3754_v8  ;;  %v2882_v38 = vpop.eup %2881  ;;  %2901 = vpow2.f32 %v2454_v28  ;;  %v1293_v8 = vadd.f32 1.0, %v2878_v46  ;;  %v2456_v2 = vmul.f32 -1.442695, %v1167_v55 }
 0x24c   : > { %v3876_v31 = vpop.eup %2883  ;;  %2903 = vrcp.f32 %v1289_v50  ;;  %v3892_v5 = vadd.f32 %v3606_v37, %v3838_v24  ;;  %v2457_v26 = vmul.f32 -1.442695, %v1169_v6  ;;  %v3898_v48 = vadd.f32 %v3606_v37, %v3843_v51 }
 0x24d   : > { %v2140_v63 = vmul.f32 %v2882_v38, %v2108_v39  ;;  %v3882_v42 = vpop.eup %2885  ;;  %2905 = vrcp.f32 %v1290_v43  ;;  %v3901_v35 = vadd.f32 %v3773_v3, %v1577_v19  ;;  %v1171_v10 = vadd.f32 %v3793_v45, %v995_v59 }
 0x24e   : > { %v3888_v40 = vpop.eup %2887  ;;  %2907 = vrcp.f32 %v1291_v7  ;;  %v2504_v24 = vmul.f32 -1.442695, %v3880_v1  ;;  %v1581_v36 = vpop.f32.mrb[60].mxu1  ;;  %v2505_v52 = vmul.f32 -1.442695, %v3886_v17  ;;  %v3924_v41 = vadd.f32 %v3616_v53, %v3848_v14 }
 0x24f   : > { %v2172_v56 = vadd.f32 %v2882_v38, %v2140_v63  ;;  %v3894_v33 = vpop.eup %2889  ;;  %2909 = vrcp.f32 %v1292_v25  ;;  %v3912_v37 = vadd.f32 %v3787_v16, %v1581_v36  ;;  %v1583_v51 = vpop.f32.mrb[61].mxu1  ;;  %v2506_v11 = vmul.f32 -1.442695, %v3892_v5 }
 0x250   : > { %v3903_v30 = vpop.eup %2891  ;;  %2911 = vrcp.f32 %v1293_v8  ;;  %v3916_v12 = vadd.f32 %v3795_v57, %v1583_v51  ;;  %v1585_v45 = vpop.f32.mrb[62].mxu1  ;;  %v2507_v28 = vmul.f32 -1.442695, %v3898_v48  ;;  %v2458_v16 = vmul.f32 -1.442695, %v1171_v10  ;;  %v4204_v51 = vld [vmem:[#allocation8_spill] sm:$0xff] }
 0x251   : > { %2204 = vst [vmem:[%s3731_s19 + $0x58] sm:$0xff] %v2172_v56  ;;  %v3908_v29 = vpop.eup %2893  ;;  %2913 = vpow2.f32 %v2455_v23  ;;  %v3920_v46 = vadd.f32 %v3801_v54, %v1585_v45  ;;  %v1587_v50 = vpop.f32.mrb[63].mxu1  ;;  %v3933_v43 = vadd.f32 %v3616_v53, %v3852_v62  ;;  %v3939_v18 = vadd.f32 %v3621_v60, %v3857_v27 }
 0x252   : > { %v2896_v3 = vpop.eup %2895  ;;  %2915 = vpow2.f32 %v2456_v2  ;;  %v3927_v15 = vadd.f32 %v3805_v58, %v1587_v50  ;;  %v3945_v39 = vadd.f32 %v3621_v60, %v3861_v49  ;;  %v1173_v53 = vadd.f32 %v3799_v22, %v995_v59 }
 0x253   : > { %v2898_v21 = vpop.eup %2897  ;;  %2917 = vpow2.f32 %v2457_v26  ;;  %v1294_v34 = vadd.f32 1.0, %v2896_v3  ;;  %v2508_v62 = vmul.f32 -1.442695, %v3924_v41  ;;  %v2509_v27 = vmul.f32 -1.442695, %v3933_v43 }
 0x254   : > { %v2900_v61 = vpop.eup %2899  ;;  %2919 = vpow2.f32 %v2504_v24  ;;  %v1295_v55 = vadd.f32 1.0, %v2898_v21  ;;  %v2510_v60 = vmul.f32 -1.442695, %v3939_v18  ;;  %v2511_v8 = vmul.f32 -1.442695, %v3945_v39 }
 0x255   : > { %v3929_v57 = vpop.eup %2901  ;;  %2921 = vpow2.f32 %v2505_v52  ;;  %v1296_v58 = vadd.f32 1.0, %v2900_v61  ;;  %v2459_v2 = vmul.f32 -1.442695, %v1173_v53 }
 0x256   : > { %v3935_v54 = vpop.eup %2903  ;;  %2923 = vpow2.f32 %v2506_v11  ;;  %v1591_v32 = vpop.f32.mrb[64].mxu1 }
 0x257   : > { %v3941_v14 = vpop.eup %2905  ;;  %2925 = vpow2.f32 %v2507_v28  ;;  %v1769_v25 = vadd.f32 %v3817_v4, %v1591_v32  ;;  %v1593_v6 = vpop.f32.mrb[65].mxu1 }
 0x258   : > { %v3947_v7 = vpop.eup %2907  ;;  %2927 = vpow2.f32 %v2458_v16  ;;  %v3959_v49 = vadd.f32 %v3822_v13, %v1593_v6  ;;  %v1595_v22 = vpop.f32.mrb[66].mxu1  ;;  %v4203_v13 = vld [vmem:[#allocation7_spill] sm:$0xff] }
 0x259   : > { %v3951_v38 = vpop.eup %2909  ;;  %2929 = vrcp.f32 %v1294_v34  ;;  %v3965_v23 = vadd.f32 %v3827_v0, %v1595_v22  ;;  %v1597_v56 = vpop.f32.mrb[67].mxu1  ;;  %v3976_v10 = vadd.f32 %v4203_v13, %v3866_v47  ;;  %v3980_v0 = vadd.f32 %v4203_v13, %v3870_v44 }
 0x25a   : > { %v3955_v19 = vpop.eup %2911  ;;  %2931 = vrcp.f32 %v1295_v55  ;;  %v3970_v59 = vadd.f32 %v3829_v9, %v1597_v56  ;;  %v3984_v9 = vadd.f32 %v4204_v51, %v3874_v20  ;;  %v3988_v47 = vadd.f32 %v4204_v51, %v3901_v35 }
 0x25b   : > { %v3961_v63 = vpop.eup %2913  ;;  %2933 = vrcp.f32 %v1296_v58  ;;  %v2512_v44 = vmul.f32 -1.442695, %v3976_v10  ;;  %v2513_v61 = vmul.f32 -1.442695, %v3980_v0  ;;  %v4205_v58 = vld [vmem:[#allocation9_spill] sm:$0xff] }
 0x25c   : > { %v3967_v4 = vpop.eup %2915  ;;  %2935 = vpow2.f32 %v2508_v62  ;;  %v2514_v16 = vmul.f32 -1.442695, %v3984_v9  ;;  %v2515_v35 = vmul.f32 -1.442695, %v3988_v47  ;;  %v4004_v53 = vadd.f32 %v4205_v58, %v3912_v37 }
 0x25d   : > { %v3972_v26 = vpop.eup %2917  ;;  %2937 = vpow2.f32 %v2509_v27  ;;  %v4008_v32 = vadd.f32 %v4205_v58, %v3916_v12 }
 0x25e   : > { %v2920_v24 = vpop.eup %2919  ;;  %2939 = vpow2.f32 %v2510_v60  ;;  %v4206_v60 = vld [vmem:[#allocation10_spill] sm:$0xff]  ;;  %v2516_v12 = vmul.f32 -1.442695, %v4004_v53 }
 0x25f   : > { %v2922_v36 = vpop.eup %2921  ;;  %v2013_v52 = vadd.f32 1.0, %v2920_v24  ;;  %2941 = vpow2.f32 %v2511_v8  ;;  %v4012_v22 = vadd.f32 %v4206_v60, %v3920_v46  ;;  %v4016_v37 = vadd.f32 %v4206_v60, %v3927_v15  ;;  %v4207_v24 = vld [vmem:[#allocation11_spill] sm:$0xff] }
 0x260   : > { %v2924_v3 = vpop.eup %2923  ;;  %2943 = vpow2.f32 %v2459_v2  ;;  %v2014_v11 = vadd.f32 1.0, %v2922_v36  ;;  %v4020_v36 = vadd.f32 %v4207_v24, %v1769_v25  ;;  %v2517_v51 = vmul.f32 -1.442695, %v4008_v32 }
 0x261   : > { %v2926_v45 = vpop.eup %2925  ;;  %2945 = vrcp.f32 %v2013_v52  ;;  %v2015_v21 = vadd.f32 1.0, %v2924_v3 }
 0x262   : > { %v3991_v28 = vpop.eup %2927  ;;  %2947 = vrcp.f32 %v2014_v11  ;;  %v2016_v50 = vadd.f32 1.0, %v2926_v45  ;;  %v2518_v11 = vmul.f32 -1.442695, %v4012_v22 }
 0x263   : > { %v3994_v20 = vpop.eup %2929  ;;  %2949 = vrcp.f32 %v2015_v21  ;;  %v2519_v21 = vmul.f32 -1.442695, %v4016_v37 }
 0x264   : > { %v3997_v34 = vpop.eup %2931  ;;  %2951 = vrcp.f32 %v2016_v50  ;;  %v2520_v50 = vmul.f32 -1.442695, %v4020_v36 }
 0x265   : > { %v4000_v55 = vpop.eup %2933  ;;  %2953 = vpow2.f32 %v2512_v44 }
 0x266   : > { %v2936_v62 = vpop.eup %2935  ;;  %2955 = vpow2.f32 %v2513_v61  ;;  %v4032_v61 = vadd.f32 %v4207_v24, %v3959_v49 }
 0x267   : > { %v2938_v27 = vpop.eup %2937  ;;  %v2017_v6 = vadd.f32 1.0, %v2936_v62  ;;  %2957 = vpow2.f32 %v2514_v16 }
 0x268   : > { %v2940_v8 = vpop.eup %2939  ;;  %v2018_v56 = vadd.f32 1.0, %v2938_v27  ;;  %2959 = vpow2.f32 %v2515_v35  ;;  %v2521_v24 = vmul.f32 -1.442695, %v4032_v61 }
 0x269   : > { %v2942_v2 = vpop.eup %2941  ;;  %2961 = vrcp.f32 %v2017_v6  ;;  %v2019_v13 = vadd.f32 1.0, %v2940_v8 }
 0x26a   : > { %v4022_v52 = vpop.eup %2943  ;;  %2963 = vrcp.f32 %v2018_v56  ;;  %v2020_v46 = vadd.f32 1.0, %v2942_v2 }
 0x26b   : > { %v2946_v3 = vpop.eup %2945  ;;  %2965 = vrcp.f32 %v2019_v13 }
 0x26c   : > { %v2948_v15 = vpop.eup %2947  ;;  %v2109_v45 = vmul.f32 %v2946_v3, %v3880_v1  ;;  %2967 = vrcp.f32 %v2020_v46  ;;  %v4208_v1 = vld [vmem:[#allocation12_spill] sm:$0xff] }
 0x26d   : > { %v2950_v44 = vpop.eup %2949  ;;  %v2110_v25 = vmul.f32 %v2948_v15, %v3886_v17  ;;  %2969 = vpow2.f32 %v2516_v12  ;;  %v4038_v62 = vadd.f32 %v4208_v1, %v3965_v23  ;;  %v4044_v49 = vadd.f32 %v4208_v1, %v3970_v59 }
 0x26e   : > { %v2952_v16 = vpop.eup %2951  ;;  %v2141_v35 = vmul.f32 %v3876_v31, %v2109_v45  ;;  %v2111_v58 = vmul.f32 %v2950_v44, %v3892_v5  ;;  %2971 = vpow2.f32 %v2517_v51 }
 0x26f   : > { %v2954_v27 = vpop.eup %2953  ;;  %v2142_v17 = vmul.f32 %v3882_v42, %v2110_v25  ;;  %v2112_v6 = vmul.f32 %v2952_v16, %v3898_v48  ;;  %2973 = vpow2.f32 %v2518_v11  ;;  %v2522_v3 = vmul.f32 -1.442695, %v4038_v62 }
 0x270   : > { %v2956_v60 = vpop.eup %2955  ;;  %v2173_v8 = vadd.f32 %v3876_v31, %v2141_v35  ;;  %v2143_v5 = vmul.f32 %v3888_v40, %v2111_v58  ;;  %v2021_v56 = vadd.f32 1.0, %v2954_v27  ;;  %2975 = vpow2.f32 %v2519_v21 }
 0x271   : > { %v2958_v23 = vpop.eup %2957  ;;  %v2174_v2 = vadd.f32 %v3882_v42, %v2142_v17  ;;  %v2144_v13 = vmul.f32 %v3894_v33, %v2112_v6  ;;  %v2022_v48 = vadd.f32 1.0, %v2956_v60  ;;  %2977 = vpow2.f32 %v2520_v50 }
 0x272   : > { %v2960_v12 = vpop.eup %2959  ;;  %2205 = vst [vmem:[%s3731_s19 + $0x60] sm:$0xff] %v2173_v8  ;;  %v2175_v59 = vadd.f32 %v3888_v40, %v2143_v5  ;;  %2979 = vrcp.f32 %v2021_v56  ;;  %v2023_v31 = vadd.f32 1.0, %v2958_v23  ;;  %v2523_v40 = vmul.f32 -1.442695, %v4044_v49 }
 0x273   : > { %v2962_v46 = vpop.eup %2961  ;;  %2206 = vst [vmem:[%s3731_s19 + $0x68] sm:$0xff] %v2174_v2  ;;  %v2176_v51 = vadd.f32 %v3894_v33, %v2144_v13  ;;  %2981 = vrcp.f32 %v2022_v48  ;;  %v2024_v42 = vadd.f32 1.0, %v2960_v12  ;;  %v1297_v21 = vadd.f32 1.0, %v3929_v57 }
 0x274   : > { %v2964_v11 = vpop.eup %2963  ;;  %2207 = vst [vmem:[%s3731_s19 + $0x70] sm:$0xff] %v2175_v59  ;;  %v2113_v15 = vmul.f32 %v2962_v46, %v3924_v41  ;;  %2983 = vrcp.f32 %v2023_v31  ;;  %v1298_v5 = vadd.f32 1.0, %v3961_v63  ;;  %v1299_v2 = vadd.f32 1.0, %v3967_v4 }
 0x275   : > { %v2966_v45 = vpop.eup %2965  ;;  %2208 = vst [vmem:[%s3731_s19 + $0x78] sm:$0xff] %v2176_v51  ;;  %v2114_v44 = vmul.f32 %v2964_v11, %v3933_v43  ;;  %2985 = vrcp.f32 %v2024_v42  ;;  %v1300_v59 = vadd.f32 1.0, %v3972_v26  ;;  %v1301_v42 = vadd.f32 1.0, %v3991_v28 }
 0x276   : > { %v2968_v25 = vpop.eup %2967  ;;  %v2145_v33 = vmul.f32 %v3903_v30, %v2113_v15  ;;  %v2115_v50 = vmul.f32 %v2966_v45, %v3939_v18  ;;  %2987 = vpow2.f32 %v2521_v24 }
 0x277   : > { %v2970_v16 = vpop.eup %2969  ;;  %v2146_v41 = vmul.f32 %v3908_v29, %v2114_v44  ;;  %v2116_v35 = vmul.f32 %v2968_v25, %v3945_v39  ;;  %2989 = vpow2.f32 %v2522_v3 }
 0x278   : > { %v2972_v58 = vpop.eup %2971  ;;  %v2177_v57 = vadd.f32 %v3903_v30, %v2145_v33  ;;  %v2147_v43 = vmul.f32 %v3935_v54, %v2115_v50  ;;  %v2025_v1 = vadd.f32 1.0, %v2970_v16  ;;  %2991 = vpow2.f32 %v2523_v40 }
 0x279   : > { %v2974_v27 = vpop.eup %2973  ;;  %2993 = vrcp.f32 %v1297_v21  ;;  %v2178_v18 = vadd.f32 %v3908_v29, %v2146_v41  ;;  %v2148_v17 = vmul.f32 %v3941_v14, %v2116_v35  ;;  %v2026_v6 = vadd.f32 1.0, %v2972_v58 }
 0x27a   : > { %v2976_v60 = vpop.eup %2975  ;;  %2209 = vst [vmem:[%s3731_s19 + $0x80] sm:$0xff] %v2177_v57  ;;  %v2179_v39 = vadd.f32 %v3935_v54, %v2147_v43  ;;  %2995 = vrcp.f32 %v2025_v1  ;;  %v2027_v30 = vadd.f32 1.0, %v2974_v27 }
 0x27b   : > { %v2978_v8 = vpop.eup %2977  ;;  %2210 = vst [vmem:[%s3731_s19 + $0x88] sm:$0xff] %v2178_v18  ;;  %v2180_v56 = vadd.f32 %v3941_v14, %v2148_v17  ;;  %2997 = vrcp.f32 %v2026_v6  ;;  %v2028_v23 = vadd.f32 1.0, %v2976_v60 }
 0x27c   : > { %v2980_v29 = vpop.eup %2979  ;;  %2211 = vst [vmem:[%s3731_s19 + $0x90] sm:$0xff] %v2179_v39  ;;  %2999 = vrcp.f32 %v2027_v30  ;;  %v2029_v13 = vadd.f32 1.0, %v2978_v8 }
 0x27d   : > { %v2982_v48 = vpop.eup %2981  ;;  %2212 = vst [vmem:[%s3731_s19 + $0x98] sm:$0xff] %v2180_v56  ;;  %v2117_v54 = vmul.f32 %v2980_v29, %v3976_v10  ;;  %3001 = vrcp.f32 %v2028_v23 }
 0x27e   : > { %v2984_v12 = vpop.eup %2983  ;;  %v2118_v63 = vmul.f32 %v2982_v48, %v3980_v0  ;;  %3003 = vrcp.f32 %v2029_v13 }
 0x27f   : > { %v2986_v14 = vpop.eup %2985  ;;  %3005 = vrcp.f32 %v1298_v5  ;;  %v2149_v31 = vmul.f32 %v3947_v7, %v2117_v54  ;;  %v2119_v4 = vmul.f32 %v2984_v12, %v3984_v9 }
 0x280   : > { %v2988_v24 = vpop.eup %2987  ;;  %3007 = vrcp.f32 %v1299_v2  ;;  %v2150_v46 = vmul.f32 %v3951_v38, %v2118_v63  ;;  %v2120_v10 = vmul.f32 %v2986_v14, %v3988_v47  ;;  %v1302_v47 = vadd.f32 1.0, %v4022_v52 }
 0x281   : > { %v2990_v51 = vpop.eup %2989  ;;  %v2181_v26 = vadd.f32 %v3947_v7, %v2149_v31  ;;  %v2151_v0 = vmul.f32 %v3955_v19, %v2119_v4  ;;  %v2030_v3 = vadd.f32 1.0, %v2988_v24  ;;  %3009 = vrcp.f32 %v1300_v59 }
 0x282   : > { %v2992_v11 = vpop.eup %2991  ;;  %v2182_v9 = vadd.f32 %v3951_v38, %v2150_v46  ;;  %v2152_v15 = vmul.f32 %v3994_v20, %v2120_v10  ;;  %v2031_v40 = vadd.f32 1.0, %v2990_v51 }
 0x283   : > { %v2994_v45 = vpop.eup %2993  ;;  %2213 = vst [vmem:[%s3731_s19 + $0xa0] sm:$0xff] %v2181_v26  ;;  %v2183_v28 = vadd.f32 %v3955_v19, %v2151_v0  ;;  %3011 = vrcp.f32 %v2030_v3  ;;  %v2032_v7 = vadd.f32 1.0, %v2992_v11 }
 0x284   : > { %v2996_v21 = vpop.eup %2995  ;;  %2214 = vst [vmem:[%s3731_s19 + $0xa8] sm:$0xff] %v2182_v9  ;;  %v2184_v44 = vadd.f32 %v3994_v20, %v2152_v15  ;;  %3013 = vrcp.f32 %v2031_v40 }
 0x285   : > { %v2998_v25 = vpop.eup %2997  ;;  %2215 = vst [vmem:[%s3731_s19 + $0xb0] sm:$0xff] %v2183_v28  ;;  %v2121_v38 = vmul.f32 %v2996_v21, %v4004_v53  ;;  %3015 = vrcp.f32 %v2032_v7 }
 0x286   : > { %v3000_v33 = vpop.eup %2999  ;;  %3017 = vrcp.f32 %v1301_v42  ;;  %2216 = vst [vmem:[%s3731_s19 + $0xb8] sm:$0xff] %v2184_v44  ;;  %v2122_v52 = vmul.f32 %v2998_v25, %v4008_v32 }
 0x287   : > { %v3002_v50 = vpop.eup %3001  ;;  %3019 = vrcp.f32 %v1302_v47  ;;  %v2153_v19 = vmul.f32 %v3997_v34, %v2121_v38  ;;  %v2123_v16 = vmul.f32 %v3000_v33, %v4012_v22 }
 0x288   : > { %v3004_v20 = vpop.eup %3003  ;;  %v2154_v41 = vmul.f32 %v4000_v55, %v2122_v52  ;;  %v2124_v53 = vmul.f32 %v3002_v50, %v4016_v37 }
 0x289   : > { %v3006_v35 = vpop.eup %3005  ;;  %v2185_v58 = vadd.f32 %v3997_v34, %v2153_v19  ;;  %v2155_v57 = vmul.f32 %v2994_v45, %v2123_v16  ;;  %v2125_v32 = vmul.f32 %v3004_v20, %v4020_v36 }
 0x28a   : > { %v3008_v43 = vpop.eup %3007  ;;  %v2186_v1 = vadd.f32 %v4000_v55, %v2154_v41  ;;  %v2156_v27 = vmul.f32 %v3006_v35, %v2124_v53 }
 0x28b   : > { %2217 = vst [vmem:[%s3731_s19 + $0xc0] sm:$0xff] %v2185_v58  ;;  %v2187_v22 = vadd.f32 %v2994_v45, %v2155_v57  ;;  %v2157_v18 = vmul.f32 %v3008_v43, %v2125_v32  ;;  %v3010_v17 = vpop.eup %3009 }
 0x28c   : > { %2218 = vst [vmem:[%s3731_s19 + $0xc8] sm:$0xff] %v2186_v1  ;;  %v2188_v37 = vadd.f32 %v3006_v35, %v2156_v27 }
 0x28d   : > { %v3012_v6 = vpop.eup %3011  ;;  %2219 = vst [vmem:[%s3731_s19 + $0xd0] sm:$0xff] %v2187_v22  ;;  %v2189_v34 = vadd.f32 %v3008_v43, %v2157_v18 }
 0x28e   : > { %v3014_v60 = vpop.eup %3013  ;;  %2220 = vst [vmem:[%s3731_s19 + $0xd8] sm:$0xff] %v2188_v37  ;;  %v2126_v36 = vmul.f32 %v3012_v6, %v4032_v61 }
 0x28f   : > { %v3016_v39 = vpop.eup %3015  ;;  %2221 = vst [vmem:[%s3731_s19 + $0xe0] sm:$0xff] %v2189_v34  ;;  %v2127_v55 = vmul.f32 %v3014_v60, %v4038_v62 }
 0x290   : > { %v3018_v30 = vpop.eup %3017  ;;  %v2158_v8 = vmul.f32 %v3010_v17, %v2126_v36  ;;  %v2128_v5 = vmul.f32 %v3016_v39, %v4044_v49 }
 0x291   : > { %v3020_v56 = vpop.eup %3019  ;;  %v2159_v23 = vmul.f32 %v3018_v30, %v2127_v55 }
 0x292   : > { %v2190_v29 = vadd.f32 %v3010_v17, %v2158_v8  ;;  %v2160_v2 = vmul.f32 %v3020_v56, %v2128_v5 }
 0x293   : > { %v2191_v61 = vadd.f32 %v3018_v30, %v2159_v23 }
 0x294   : > { %2222 = vst [vmem:[%s3731_s19 + $0xe8] sm:$0xff] %v2190_v29  ;;  %v2192_v62 = vadd.f32 %v3020_v56, %v2160_v2 }
 0x295   : > { %2223 = vst [vmem:[%s3731_s19 + $0xf0] sm:$0xff] %v2191_v61 }
 0x296   : > { %2224 = vst [vmem:[%s3731_s19 + $0xf8] sm:$0xff] %v2192_v62 }
 0x297   : > { %3034 = shalt.err (!%p3031_p5)
}
 0x298   : > { %s3035_s12 = scalar_lea.hbm %s4119_s11, 4096  ;;  %s3039_s28 = scalar_lea.hbm %s4184_s10, 8192 }
 0x299   : > { %p3036_p6 = scmp.ne.s32.totalorder %s4119_s11, %s3035_s12  ;;  %p3040_p10 = scmp.lt.u32.totalorder %s4119_s11, %s4184_s10 }
 0x29a   : > { %p3041_p11 = scmp.lt.u32.totalorder %s3039_s28, %s3035_s12  ;;  %p3043_p13 = scmp.lt.u32.totalorder %s3035_s12, %s4119_s11 }
 0x29b   : > { %p3037_p7 = pnand %p3036_p6, %p3200_p4 }
 0x29c   : > { %p3042_p12 = por %p3041_p11, %p3040_p10 }
 0x29d   : > { %p3038_p9 = pneg %p3037_p7 }
 0x29e   : > { %p3044_p0 = por %p3043_p13, %p3042_p12 }
 0x2a0   : > { %p3045_p1 = pnand %p3044_p0, %p3038_p9 }
 0x2a2   : > { %3048 = shalt.err (!%p3045_p1)
}
 0x2a3   : > { %s3103_s1 = smov 256   ;;  %s3104_s22 = smov 16  }
 0x2a4   : > { %2657 = dma.vmem_to_hbm [thread:$0]  (%p3200_p4), %s4121_s24, 4096, %s4119_s11, %s4128_s16, %s3103_s1, %s3103_s1, %s3104_s22  }
 0x2a5 PF: > { %p2663_p2 = scmp.ge.s32.totalorder %s3099_s18, 2  ;;  %s2256_s27 = sand.u32 1, %s3079_s13  }
 0x2a6   : > { %s2257_s12 = scalar_lea.sflag [#allocation5], %s2256_s27 }
 0x2a7   : > { %p2660_p3 = pnand %p2663_p2, %p3207_p8 }
 0x2a9   : > { %3074 = dma.done.wait (!%p2660_p3), %s2257_s12, 4096  }
 0x2aa   : > { %3076 = vsyncadd (!%p2660_p3), %s2257_s12, 4294963200  ;;  %s23_s18 = sadd.s32 1, %s3099_s18   ;;  %s4209_s13 = smov %s3083_s14 }
 0x2ab   : > { %p20_p5 = scmp.ge.s32.totalorder %s23_s18, 4   ;;  %s4210_s14 = smov %s3087_s15 }
 0x2ac   : > { %s4211_s15 = smov %s3213_s26  ;;  %s4212_s16 = smov %s3095_s17 }
 0x2ad   : > { %s4213_s17 = smov %s4215_s21  ;;  %22 = sbr.rel (!%p20_p5) target bundleno = 6 (0x6), region = 111 }
 0x2b4   :  { %2262 = vsyncpa [#allocation5], 1 }
 0x2b5   :  { %2264 = vsyncpa [#allocation5 + $0x1], 1 }

</bundles_post_ra>
